<compile_context>
chip_gen: v6e
topology: v6e:2x2x1
jax: 0.10.0
libtpu: 0.0.40
codegen_flags: <defaults>
</compile_context>

<pallas_src>
import numpy as np
import jax
import jax.numpy as jnp
from jax import lax
from jax.experimental import pallas as pl
from jax.experimental.pallas import tpu as pltpu


# ----------------------------------------------------------------------------
# Fused forward kernel.
# ----------------------------------------------------------------------------
def _network3d_kernel(x_ref, b1_ref, t1_ref, bias1_ref,
                      b2_ref, t2_ref, bias2_ref,
                      fw1_hbm, fb1_ref, fw2_hbm, fb2_ref, fw3_ref, fb3_ref,
                      out_ref,
                      stk1_ref, stk2_ref, xflat_ref,
                      fw1_ref, fw2_ref, dma_sem):
    f32, bf16 = jnp.float32, jnp.bfloat16
    n_batch = out_ref.shape[0]

    # Kick off the big fc-weight fetches; they overlap the two conv stages.
    cp1 = pltpu.make_async_copy(fw1_hbm, fw1_ref, dma_sem.at[0])
    cp2 = pltpu.make_async_copy(fw2_hbm, fw2_ref, dma_sem.at[1])
    cp1.start()
    cp2.start()

    # -------------------- stage 1: conv1 + bias + ReLU + 2x2 pool ----------
    x = x_ref[...]                                  # (N*H, W) f32
    r0 = x.shape[0]
    r0p = stk1_ref.shape[0] // 3                    # sublane-padded row count
    wc1 = stk1_ref.shape[1]                         # conv1 output width
    stk1_ref[...] = jnp.zeros_like(stk1_ref)        # pad rows must be 0
    for kw in range(3):                             # stack kw taps along K
        stk1_ref[kw * r0p:kw * r0p + r0, :] = x[:, kw:kw + wc1]
    rows1 = b1_ref.shape[0] // 2
    conv1 = jnp.dot(b1_ref[...], stk1_ref[...].astype(bf16),
                    preferred_element_type=f32)     # (2*rows1, wc1)
    hmax1 = jnp.maximum(conv1[:rows1, :], conv1[rows1:, :])     # pool rows
    cmax1 = jnp.maximum(hmax1[:, :wc1 - 1], hmax1[:, 1:])       # pool cols cmp
    h1 = jnp.maximum(jnp.dot(cmax1, t1_ref[...], preferred_element_type=f32)
                     + bias1_ref[...], 0.0)         # (rows1, pw1), rows=(n,c,hh)

    # -------------------- stage 2: conv2 + bias + ReLU + 2x2 pool ----------
    wc2 = stk2_ref.shape[1]
    for kw in range(3):
        stk2_ref[kw * rows1:(kw + 1) * rows1, :] = h1[:, kw:kw + wc2]
    rows2 = b2_ref.shape[0] // 2
    conv2 = jnp.dot(b2_ref[...], stk2_ref[...].astype(bf16),
                    preferred_element_type=f32)     # (2*rows2, wc2)
    hmax2 = jnp.maximum(conv2[:rows2, :], conv2[rows2:, :])
    cmax2 = jnp.maximum(hmax2[:, :wc2 - 1], hmax2[:, 1:])
    h2 = jnp.maximum(jnp.dot(cmax2, t2_ref[...], preferred_element_type=f32)
                     + bias2_ref[...], 0.0)         # (rows2, pw2), rows=(c,hh,n)

    # -------------------- flatten to (N, 512) in PyTorch (C,H,W) order -----
    # h2 rows are ordered (block r=(c,hh), n) with batch innermost, so block r
    # is the contiguous row range [r*N, (r+1)*N) and maps to lane range
    # [r*pw2, (r+1)*pw2) of the flat feature vector.  32 independent masked
    # stores (store/XLU slots, off the MXU) build the lane-dense activation.
    wp2 = h2.shape[1]
    n_blocks = rows2 // n_batch
    for r in range(n_blocks):
        xflat_ref[:, r * wp2:(r + 1) * wp2] = h2[r * n_batch:(r + 1) * n_batch, :]

    # -------------------- fc1 / fc2 / fc3 ----------------------------------
    cp1.wait()
    a = jnp.maximum(jnp.dot(xflat_ref[...].astype(bf16), fw1_ref[...],
                            preferred_element_type=f32) + fb1_ref[...], 0.0)
    cp2.wait()
    a = jnp.maximum(jnp.dot(a.astype(bf16), fw2_ref[...],
                            preferred_element_type=f32) + fb2_ref[...], 0.0)
    out_ref[...] = (jnp.dot(a.astype(bf16), fw3_ref[...],
                            preferred_element_type=f32) + fb3_ref[...])


# ----------------------------------------------------------------------------
# One-time host-side parameter prep (hoisted out of the forward).
# ----------------------------------------------------------------------------
def prepare_params(params, batch, height, width):
    """Fold conv weights + the row half of each 2x2 max-pool into structured
    matmul operands, with the two pool-row parities stacked along M and the 3
    kw taps stacked along K.  Row layouts used by the kernel:
      stage-0 input  : r0(n, i)     = n*H + i                (N*H, W)
      stage-1 output : r1(n, c, hh) = (n*C1 + c)*Hp1 + hh    (N*C1*Hp1, Wp1)
      stage-2 output : r2(c, hh, n) = (c*Hp2 + hh)*N + n     (C2*Hp2*N, Wp2)
    Batch is innermost at stage 2 so the PyTorch (C,H,W) flatten is a sequence
    of contiguous N-row blocks that the kernel lays lane-dense for fc1.
    """
    w1 = np.asarray(params["conv1_w"], np.float32)     # (C1, 1, K, K)  OIHW
    b1 = np.asarray(params["conv1_b"], np.float32)
    w2 = np.asarray(params["conv2_w"], np.float32)     # (C2, C1, K, K)
    b2 = np.asarray(params["conv2_b"], np.float32)
    c1, c2, k = w1.shape[0], w2.shape[0], w1.shape[2]
    n, h, w = batch, height, width

    ch1, cw1 = h - (k - 1), w - (k - 1)                # conv1 valid output
    ph1, pw1 = ch1 // 2, cw1 // 2                      # pool1 (floor mode)
    ch2, cw2 = ph1 - (k - 1), pw1 - (k - 1)            # conv2 valid output
    ph2, pw2 = ch2 // 2, cw2 // 2                      # pool2

    r0 = n * h
    r0p = ((r0 + 7) // 8) * 8                          # align kw-stack offsets
    R1 = n * c1 * ph1
    R2 = c2 * ph2 * n

    def row0(nn, i): return nn * h + i
    def row1(nn, c, hh): return (nn * c1 + c) * ph1 + hh
    def row2(c, hh, nn): return (c * ph2 + hh) * n + nn

    # conv1 taps, row-pool parity stacked along M, kw stacked along K.
    B1 = np.zeros((2 * R1, k * r0p), np.float32)
    bias1 = np.zeros((R1, 1), np.float32)
    for p in range(2):
        for kw in range(k):
            for nn in range(n):
                for c in range(c1):
                    for hh in range(ph1):
                        for kh in range(k):
                            B1[p * R1 + row1(nn, c, hh),
                               kw * r0p + row0(nn, 2 * hh + p + kh)] += w1[c, 0, kh, kw]
    for nn in range(n):
        for c in range(c1):
            for hh in range(ph1):
                bias1[row1(nn, c, hh), 0] = b1[c]

    B2 = np.zeros((2 * R2, k * R1), np.float32)
    bias2 = np.zeros((R2, 1), np.float32)
    for p in range(2):
        for kw in range(k):
            for c in range(c2):
                for hh in range(ph2):
                    for nn in range(n):
                        for ci in range(c1):
                            for kh in range(k):
                                B2[p * R2 + row2(c, hh, nn),
                                   kw * R1 + row1(nn, ci, 2 * hh + p + kh)] += w2[c, ci, kh, kw]
    for c in range(c2):
        for hh in range(ph2):
            for nn in range(n):
                bias2[row2(c, hh, nn), 0] = b2[c]

    # 0/1 even-column selector (column half of each 2x2 max-pool).
    def even_select(w_conv, w_pool):
        t = np.zeros((w_conv - 1, w_pool), np.float32)
        for j in range(w_pool):
            t[2 * j, j] = 1.0
        return t

    feat = c2 * ph2 * pw2
    fc1_w = np.asarray(params["fc1_w"], np.float32)
    assert fc1_w.shape[1] == feat, (fc1_w.shape, feat)

    bf16 = jnp.bfloat16
    return dict(
        B1=jnp.asarray(B1, bf16), T1=jnp.asarray(even_select(cw1, pw1)),
        bias1=jnp.asarray(bias1),
        B2=jnp.asarray(B2, bf16), T2=jnp.asarray(even_select(cw2, pw2)),
        bias2=jnp.asarray(bias2),
        fc1_w=jnp.asarray(fc1_w.T, bf16),
        fc1_b=jnp.asarray(np.asarray(params["fc1_b"], np.float32).reshape(1, -1)),
        fc2_w=jnp.asarray(np.asarray(params["fc2_w"], np.float32).T, bf16),
        fc2_b=jnp.asarray(np.asarray(params["fc2_b"], np.float32).reshape(1, -1)),
        fc3_w=jnp.asarray(np.asarray(params["fc3_w"], np.float32).T, bf16),
        fc3_b=jnp.asarray(np.asarray(params["fc3_b"], np.float32).reshape(1, -1)),
        dims=dict(batch=n, height=h, width=w, r0_pad=r0p,
                  wc1=cw1, wc2=cw2, r1_rows=R1, r2_rows=R2, feat=feat),
    )


# ----------------------------------------------------------------------------
# Forward wrapper: one free reshape + one fused pallas_call.
# ----------------------------------------------------------------------------
def network3d_forward(prepped, x_nchw):
    batch, chan, height, width = x_nchw.shape
    d = prepped["dims"]
    assert chan == 1
    assert (batch, height, width) == (d["batch"], d["height"], d["width"]), \
        "prepare_params() baked this (batch, H, W); re-run it for new shapes"

    x2d = x_nchw.reshape(batch * height, width)      # free view since C == 1
    num_labels = prepped["fc3_w"].shape[1]
    feat = d["feat"]

    vmem = pl.BlockSpec(memory_space=pltpu.MemorySpace.VMEM)
    hbm = pl.BlockSpec(memory_space=pl.ANY)

    flops = 2 * (
        prepped["B1"].shape[0] * prepped["B1"].shape[1] * d["wc1"]
        + prepped["T1"].shape[0] * prepped["T1"].shape[1] * d["r1_rows"]
        + prepped["B2"].shape[0] * prepped["B2"].shape[1] * d["wc2"]
        + prepped["T2"].shape[0] * prepped["T2"].shape[1] * d["r2_rows"]
        + batch * feat * 256 + batch * 256 * 128 + batch * 128 * num_labels)
    operands = (x2d, prepped["B1"], prepped["T1"], prepped["bias1"],
                prepped["B2"], prepped["T2"], prepped["bias2"],
                prepped["fc1_w"], prepped["fc1_b"],
                prepped["fc2_w"], prepped["fc2_b"],
                prepped["fc3_w"], prepped["fc3_b"])
    bytes_accessed = sum(int(np.prod(a.shape)) * a.dtype.itemsize
                         for a in operands) + batch * num_labels * 4

    return pl.pallas_call(
        _network3d_kernel,
        out_shape=jax.ShapeDtypeStruct((batch, num_labels), jnp.float32),
        in_specs=[vmem, vmem, vmem, vmem, vmem, vmem, vmem,
                  hbm, vmem, hbm, vmem, vmem, vmem],
        out_specs=pl.BlockSpec(memory_space=pltpu.MemorySpace.VMEM),
        scratch_shapes=[
            pltpu.VMEM((3 * d["r0_pad"], d["wc1"]), jnp.float32),    # stk1
            pltpu.VMEM((3 * d["r1_rows"], d["wc2"]), jnp.float32),   # stk2
            pltpu.VMEM((batch, feat), jnp.float32),                  # xflat
            pltpu.VMEM(tuple(prepped["fc1_w"].shape), jnp.bfloat16),  # fc1 buf
            pltpu.VMEM(tuple(prepped["fc2_w"].shape), jnp.bfloat16),  # fc2 buf
            pltpu.SemaphoreType.DMA((2,)),
        ],
        cost_estimate=pl.CostEstimate(flops=int(flops), transcendentals=0,
                                      bytes_accessed=int(bytes_accessed)),
    )(*operands)


# ----------------------------------------------------------------------------
# Deterministic parameter init (PyTorch-shaped tensors).
# ----------------------------------------------------------------------------
def init_params(key, input_dim, num_labels):
    ks = jax.random.split(key, 10)
    s = 0.1
    return dict(
        conv1_w=jax.random.normal(ks[0], (8, 1, 3, 3), jnp.float32) * s,
        conv1_b=jax.random.normal(ks[1], (8,), jnp.float32) * s,
        conv2_w=jax.random.normal(ks[2], (16, 8, 3, 3), jnp.float32) * s,
        conv2_b=jax.random.normal(ks[3], (16,), jnp.float32) * s,
        fc1_w=jax.random.normal(ks[4], (256, input_dim), jnp.float32)
        * (1.0 / np.sqrt(input_dim)),
        fc1_b=jax.random.normal(ks[5], (256,), jnp.float32) * s,
        fc2_w=jax.random.normal(ks[6], (128, 256), jnp.float32) * (1.0 / np.sqrt(256)),
        fc2_b=jax.random.normal(ks[7], (128,), jnp.float32) * s,
        fc3_w=jax.random.normal(ks[8], (num_labels, 128), jnp.float32)
        * (1.0 / np.sqrt(128)),
        fc3_b=jax.random.normal(ks[9], (num_labels,), jnp.float32) * s,
    )


# Pure-JAX reference of the exact PyTorch forward (f32, HIGHEST precision).
def reference_forward(params, x):
    hi = lax.Precision.HIGHEST

    def conv(x, w, b):
        y = lax.conv_general_dilated(
            x, w, window_strides=(1, 1), padding="VALID",
            dimension_numbers=("NCHW", "OIHW", "NCHW"), precision=hi)
        return y + b.reshape(1, -1, 1, 1)

    def pool(x):
        return lax.reduce_window(x, -jnp.inf, lax.max,
                                 (1, 1, 2, 2), (1, 1, 2, 2), "VALID")

    x = pool(jax.nn.relu(conv(x, params["conv1_w"], params["conv1_b"])))
    x = pool(jax.nn.relu(conv(x, params["conv2_w"], params["conv2_b"])))
    dim1, dim2 = x.shape[1], x.shape[2]
    x = x.reshape(-1, 16 * dim1 * dim2)              # same as torch view here
    x = jax.nn.relu(jnp.dot(x, params["fc1_w"].T, precision=hi) + params["fc1_b"])
    x = jax.nn.relu(jnp.dot(x, params["fc2_w"].T, precision=hi) + params["fc2_b"])
    return jnp.dot(x, params["fc3_w"].T, precision=hi) + params["fc3_b"]


if __name__ == "__main__":
    # Input chosen so the module's view(-1, 16*dim1*dim2) is consistent:
    # (2,1,14,70) -> conv1 (2,8,12,68) -> pool (2,8,6,34)
    #             -> conv2 (2,16,4,32) -> pool (2,16,2,16)
    # dim1=16, dim2=2 -> input_dim = 16*16*2 = 512 (= per-sample 16*2*16).
    N, H, W = 2, 14, 70
    input_dim = 16 * 16 * 2
    num_labels = 10

    key = jax.random.PRNGKey(0)
    kx, kp = jax.random.split(key)
    x = jax.random.normal(kx, (N, 1, H, W), jnp.float32)
    params = init_params(kp, input_dim, num_labels)

    prepped = prepare_params(params, N, H, W)        # one-time weight prep
    fwd = jax.jit(lambda xx: network3d_forward(prepped, xx))

    out = jax.block_until_ready(fwd(x))
    assert out.shape == (N, num_labels)

    # Tolerance accounts for bf16 matmul operands (weights stored bf16 +
    # activations rounded at the dot) vs. the f32 HIGHEST-precision reference;
    # observed deviations are a few 1e-3, so 2e-2 leaves a wide margin.
    ref = reference_forward(params, x)
    np.testing.assert_allclose(np.asarray(out), np.asarray(ref),
                               rtol=2e-2, atol=2e-2)
    print("KERNEL_OK")
</pallas_src>

<mosaic_0001>
module attributes {stable_mosaic.version = 11 : i64} {
  func.func @_network3d_kernel(%arg0: memref<28x70xf32, #tpu.memory_space<vmem>>, %arg1: memref<192x96xbf16, #tpu.memory_space<vmem>>, %arg2: memref<67x34xf32, #tpu.memory_space<vmem>>, %arg3: memref<96x1xf32, #tpu.memory_space<vmem>>, %arg4: memref<128x288xbf16, #tpu.memory_space<vmem>>, %arg5: memref<31x16xf32, #tpu.memory_space<vmem>>, %arg6: memref<64x1xf32, #tpu.memory_space<vmem>>, %arg7: memref<512x256xbf16, #tpu.memory_space<any>>, %arg8: memref<1x256xf32, #tpu.memory_space<vmem>>, %arg9: memref<256x128xbf16, #tpu.memory_space<any>>, %arg10: memref<1x128xf32, #tpu.memory_space<vmem>>, %arg11: memref<128x10xbf16, #tpu.memory_space<vmem>>, %arg12: memref<1x10xf32, #tpu.memory_space<vmem>>, %arg13: memref<2x10xf32, #tpu.memory_space<vmem>>, %arg14: memref<96x68xf32, #tpu.memory_space<vmem>>, %arg15: memref<288x32xf32, #tpu.memory_space<vmem>>, %arg16: memref<2x512xf32, #tpu.memory_space<vmem>>, %arg17: memref<512x256xbf16, #tpu.memory_space<vmem>>, %arg18: memref<256x128xbf16, #tpu.memory_space<vmem>>, %arg19: memref<2x!tpu.dma_semaphore, #tpu.memory_space<semaphore_mem>>) attributes {dimension_semantics = [], scalar_prefetch = 0 : i64, scratch_operands = 6 : i64, tpu.core_type = #tpu.core_type<tc>} {
    %c0_i32 = arith.constant 0 : i32
    %0 = tpu.memref_slice %arg19[%c0_i32] : memref<2x!tpu.dma_semaphore, #tpu.memory_space<semaphore_mem>> -> memref<1x!tpu.dma_semaphore, #tpu.memory_space<semaphore_mem>>
    %1 = tpu.memref_squeeze %0 : memref<1x!tpu.dma_semaphore, #tpu.memory_space<semaphore_mem>> -> memref<!tpu.dma_semaphore, #tpu.memory_space<semaphore_mem>>
    tpu.enqueue_dma source(%arg7 : memref<512x256xbf16, #tpu.memory_space<any>>) target(%arg17 : memref<512x256xbf16, #tpu.memory_space<vmem>>) target_semaphore(%1 : memref<!tpu.dma_semaphore, #tpu.memory_space<semaphore_mem>>)
    %c1_i32 = arith.constant 1 : i32
    %2 = tpu.memref_slice %arg19[%c1_i32] : memref<2x!tpu.dma_semaphore, #tpu.memory_space<semaphore_mem>> -> memref<1x!tpu.dma_semaphore, #tpu.memory_space<semaphore_mem>>
    %3 = tpu.memref_squeeze %2 : memref<1x!tpu.dma_semaphore, #tpu.memory_space<semaphore_mem>> -> memref<!tpu.dma_semaphore, #tpu.memory_space<semaphore_mem>>
    tpu.enqueue_dma source(%arg9 : memref<256x128xbf16, #tpu.memory_space<any>>) target(%arg18 : memref<256x128xbf16, #tpu.memory_space<vmem>>) target_semaphore(%3 : memref<!tpu.dma_semaphore, #tpu.memory_space<semaphore_mem>>)
    %c0 = arith.constant 0 : index
    %c0_0 = arith.constant 0 : index
    %4 = vector.load %arg0[%c0, %c0_0] : memref<28x70xf32, #tpu.memory_space<vmem>>, vector<28x70xf32>
    %cst = arith.constant 0.000000e+00 : f32
    %5 = vector.broadcast %cst : f32 to vector<96x68xf32>
    %c0_1 = arith.constant 0 : index
    %c0_2 = arith.constant 0 : index
    %6 = vector.load %arg14[%c0_1, %c0_2] : memref<96x68xf32, #tpu.memory_space<vmem>>, vector<96x68xf32>
    tpu.vector_store %arg14[%c0_1, %c0_2], %5 {strides = array<i32>} : memref<96x68xf32, #tpu.memory_space<vmem>>, vector<96x68xf32>,
    %7 = vector.extract_strided_slice %4 {offsets = [0, 0], sizes = [28, 68], strides = [1, 1]} : vector<28x70xf32> to vector<28x68xf32>
    %c0_3 = arith.constant 0 : index
    %c0_4 = arith.constant 0 : index
    %8 = vector.load %arg14[%c0_3, %c0_4] : memref<96x68xf32, #tpu.memory_space<vmem>>, vector<28x68xf32>
    tpu.vector_store %arg14[%c0_3, %c0_4], %7 {strides = array<i32>} : memref<96x68xf32, #tpu.memory_space<vmem>>, vector<28x68xf32>,
    %9 = vector.extract_strided_slice %4 {offsets = [0, 1], sizes = [28, 68], strides = [1, 1]} : vector<28x70xf32> to vector<28x68xf32>
    %c32 = arith.constant 32 : index
    %c0_5 = arith.constant 0 : index
    %10 = vector.load %arg14[%c32, %c0_5] : memref<96x68xf32, #tpu.memory_space<vmem>>, vector<28x68xf32>
    tpu.vector_store %arg14[%c32, %c0_5], %9 {strides = array<i32>} : memref<96x68xf32, #tpu.memory_space<vmem>>, vector<28x68xf32>,
    %11 = vector.extract_strided_slice %4 {offsets = [0, 2], sizes = [28, 68], strides = [1, 1]} : vector<28x70xf32> to vector<28x68xf32>
    %c64 = arith.constant 64 : index
    %c0_6 = arith.constant 0 : index
    %12 = vector.load %arg14[%c64, %c0_6] : memref<96x68xf32, #tpu.memory_space<vmem>>, vector<28x68xf32>
    tpu.vector_store %arg14[%c64, %c0_6], %11 {strides = array<i32>} : memref<96x68xf32, #tpu.memory_space<vmem>>, vector<28x68xf32>,
    %c0_7 = arith.constant 0 : index
    %c0_8 = arith.constant 0 : index
    %13 = vector.load %arg1[%c0_7, %c0_8] : memref<192x96xbf16, #tpu.memory_space<vmem>>, vector<192x96xbf16>
    %c0_9 = arith.constant 0 : index
    %c0_10 = arith.constant 0 : index
    %14 = vector.load %arg14[%c0_9, %c0_10] : memref<96x68xf32, #tpu.memory_space<vmem>>, vector<96x68xf32>
    %15 = arith.truncf %14 : vector<96x68xf32> to vector<96x68xbf16>
    %cst_11 = arith.constant dense<0.000000e+00> : vector<192x68xf32>
    %16 = tpu.matmul %13, %15, %cst_11 {dimension_numbers = #tpu.dot_dimension_numbers<[1], [0], [0], [1], [0, 0, 1, 1], [], []>} : vector<192x96xbf16>, vector<96x68xbf16>, vector<192x68xf32> -> vector<192x68xf32>
    %17 = vector.extract_strided_slice %16 {offsets = [0, 0], sizes = [96, 68], strides = [1, 1]} : vector<192x68xf32> to vector<96x68xf32>
    %18 = vector.extract_strided_slice %16 {offsets = [96, 0], sizes = [96, 68], strides = [1, 1]} : vector<192x68xf32> to vector<96x68xf32>
    %19 = arith.maximumf %17, %18 : vector<96x68xf32>
    %20 = vector.extract_strided_slice %19 {offsets = [0, 0], sizes = [96, 67], strides = [1, 1]} : vector<96x68xf32> to vector<96x67xf32>
    %21 = vector.extract_strided_slice %19 {offsets = [0, 1], sizes = [96, 67], strides = [1, 1]} : vector<96x68xf32> to vector<96x67xf32>
    %22 = arith.maximumf %20, %21 : vector<96x67xf32>
    %c0_12 = arith.constant 0 : index
    %c0_13 = arith.constant 0 : index
    %23 = vector.load %arg2[%c0_12, %c0_13] : memref<67x34xf32, #tpu.memory_space<vmem>>, vector<67x34xf32>
    %cst_14 = arith.constant dense<0.000000e+00> : vector<96x34xf32>
    %24 = tpu.matmul %22, %23, %cst_14 {dimension_numbers = #tpu.dot_dimension_numbers<[1], [0], [0], [1], [0, 0, 1, 1], [], []>} : vector<96x67xf32>, vector<67x34xf32>, vector<96x34xf32> -> vector<96x34xf32>
    %c0_15 = arith.constant 0 : index
    %c0_16 = arith.constant 0 : index
    %25 = vector.load %arg3[%c0_15, %c0_16] : memref<96x1xf32, #tpu.memory_space<vmem>>, vector<96x1xf32>
    %26 = vector.broadcast %25 : vector<96x1xf32> to vector<96x34xf32>
    %27 = arith.addf %24, %26 : vector<96x34xf32>
    %cst_17 = arith.constant 0.000000e+00 : f32
    %28 = vector.broadcast %cst_17 : f32 to vector<96x34xf32>
    %29 = arith.maximumf %27, %28 : vector<96x34xf32>
    %30 = vector.extract_strided_slice %29 {offsets = [0, 0], sizes = [96, 32], strides = [1, 1]} : vector<96x34xf32> to vector<96x32xf32>
    %c0_18 = arith.constant 0 : index
    %c0_19 = arith.constant 0 : index
    %31 = vector.load %arg15[%c0_18, %c0_19] : memref<288x32xf32, #tpu.memory_space<vmem>>, vector<96x32xf32>
    tpu.vector_store %arg15[%c0_18, %c0_19], %30 {strides = array<i32>} : memref<288x32xf32, #tpu.memory_space<vmem>>, vector<96x32xf32>,
    %32 = vector.extract_strided_slice %29 {offsets = [0, 1], sizes = [96, 32], strides = [1, 1]} : vector<96x34xf32> to vector<96x32xf32>
    %c96 = arith.constant 96 : index
    %c0_20 = arith.constant 0 : index
    %33 = vector.load %arg15[%c96, %c0_20] : memref<288x32xf32, #tpu.memory_space<vmem>>, vector<96x32xf32>
    tpu.vector_store %arg15[%c96, %c0_20], %32 {strides = array<i32>} : memref<288x32xf32, #tpu.memory_space<vmem>>, vector<96x32xf32>,
    %34 = vector.extract_strided_slice %29 {offsets = [0, 2], sizes = [96, 32], strides = [1, 1]} : vector<96x34xf32> to vector<96x32xf32>
    %c192 = arith.constant 192 : index
    %c0_21 = arith.constant 0 : index
    %35 = vector.load %arg15[%c192, %c0_21] : memref<288x32xf32, #tpu.memory_space<vmem>>, vector<96x32xf32>
    tpu.vector_store %arg15[%c192, %c0_21], %34 {strides = array<i32>} : memref<288x32xf32, #tpu.memory_space<vmem>>, vector<96x32xf32>,
    %c0_22 = arith.constant 0 : index
    %c0_23 = arith.constant 0 : index
    %36 = vector.load %arg4[%c0_22, %c0_23] : memref<128x288xbf16, #tpu.memory_space<vmem>>, vector<128x288xbf16>
    %c0_24 = arith.constant 0 : index
    %c0_25 = arith.constant 0 : index
    %37 = vector.load %arg15[%c0_24, %c0_25] : memref<288x32xf32, #tpu.memory_space<vmem>>, vector<288x32xf32>
    %38 = arith.truncf %37 : vector<288x32xf32> to vector<288x32xbf16>
    %cst_26 = arith.constant dense<0.000000e+00> : vector<128x32xf32>
    %39 = tpu.matmul %36, %38, %cst_26 {dimension_numbers = #tpu.dot_dimension_numbers<[1], [0], [0], [1], [0, 0, 1, 1], [], []>} : vector<128x288xbf16>, vector<288x32xbf16>, vector<128x32xf32> -> vector<128x32xf32>
    %40 = vector.extract_strided_slice %39 {offsets = [0, 0], sizes = [64, 32], strides = [1, 1]} : vector<128x32xf32> to vector<64x32xf32>
    %41 = vector.extract_strided_slice %39 {offsets = [64, 0], sizes = [64, 32], strides = [1, 1]} : vector<128x32xf32> to vector<64x32xf32>
    %42 = arith.maximumf %40, %41 : vector<64x32xf32>
    %43 = vector.extract_strided_slice %42 {offsets = [0, 0], sizes = [64, 31], strides = [1, 1]} : vector<64x32xf32> to vector<64x31xf32>
    %44 = vector.extract_strided_slice %42 {offsets = [0, 1], sizes = [64, 31], strides = [1, 1]} : vector<64x32xf32> to vector<64x31xf32>
    %45 = arith.maximumf %43, %44 : vector<64x31xf32>
    %c0_27 = arith.constant 0 : index
    %c0_28 = arith.constant 0 : index
    %46 = vector.load %arg5[%c0_27, %c0_28] : memref<31x16xf32, #tpu.memory_space<vmem>>, vector<31x16xf32>
    %cst_29 = arith.constant dense<0.000000e+00> : vector<64x16xf32>
    %47 = tpu.matmul %45, %46, %cst_29 {dimension_numbers = #tpu.dot_dimension_numbers<[1], [0], [0], [1], [0, 0, 1, 1], [], []>} : vector<64x31xf32>, vector<31x16xf32>, vector<64x16xf32> -> vector<64x16xf32>
    %c0_30 = arith.constant 0 : index
    %c0_31 = arith.constant 0 : index
    %48 = vector.load %arg6[%c0_30, %c0_31] : memref<64x1xf32, #tpu.memory_space<vmem>>, vector<64x1xf32>
    %49 = vector.broadcast %48 : vector<64x1xf32> to vector<64x16xf32>
    %50 = arith.addf %47, %49 : vector<64x16xf32>
    %cst_32 = arith.constant 0.000000e+00 : f32
    %51 = vector.broadcast %cst_32 : f32 to vector<64x16xf32>
    %52 = arith.maximumf %50, %51 : vector<64x16xf32>
    %53 = vector.extract_strided_slice %52 {offsets = [0, 0], sizes = [2, 16], strides = [1, 1]} : vector<64x16xf32> to vector<2x16xf32>
    %c0_33 = arith.constant 0 : index
    %c0_34 = arith.constant 0 : index
    %54 = vector.load %arg16[%c0_33, %c0_34] : memref<2x512xf32, #tpu.memory_space<vmem>>, vector<2x16xf32>
    tpu.vector_store %arg16[%c0_33, %c0_34], %53 {strides = array<i32>} : memref<2x512xf32, #tpu.memory_space<vmem>>, vector<2x16xf32>,
    %55 = vector.extract_strided_slice %52 {offsets = [2, 0], sizes = [2, 16], strides = [1, 1]} : vector<64x16xf32> to vector<2x16xf32>
    %c0_35 = arith.constant 0 : index
    %c16 = arith.constant 16 : index
    %56 = vector.load %arg16[%c0_35, %c16] : memref<2x512xf32, #tpu.memory_space<vmem>>, vector<2x16xf32>
    tpu.vector_store %arg16[%c0_35, %c16], %55 {strides = array<i32>} : memref<2x512xf32, #tpu.memory_space<vmem>>, vector<2x16xf32>,
    %57 = vector.extract_strided_slice %52 {offsets = [4, 0], sizes = [2, 16], strides = [1, 1]} : vector<64x16xf32> to vector<2x16xf32>
    %c0_36 = arith.constant 0 : index
    %c32_37 = arith.constant 32 : index
    %58 = vector.load %arg16[%c0_36, %c32_37] : memref<2x512xf32, #tpu.memory_space<vmem>>, vector<2x16xf32>
    tpu.vector_store %arg16[%c0_36, %c32_37], %57 {strides = array<i32>} : memref<2x512xf32, #tpu.memory_space<vmem>>, vector<2x16xf32>,
    %59 = vector.extract_strided_slice %52 {offsets = [6, 0], sizes = [2, 16], strides = [1, 1]} : vector<64x16xf32> to vector<2x16xf32>
    %c0_38 = arith.constant 0 : index
    %c48 = arith.constant 48 : index
    %60 = vector.load %arg16[%c0_38, %c48] : memref<2x512xf32, #tpu.memory_space<vmem>>, vector<2x16xf32>
    tpu.vector_store %arg16[%c0_38, %c48], %59 {strides = array<i32>} : memref<2x512xf32, #tpu.memory_space<vmem>>, vector<2x16xf32>,
    %61 = vector.extract_strided_slice %52 {offsets = [8, 0], sizes = [2, 16], strides = [1, 1]} : vector<64x16xf32> to vector<2x16xf32>
    %c0_39 = arith.constant 0 : index
    %c64_40 = arith.constant 64 : index
    %62 = vector.load %arg16[%c0_39, %c64_40] : memref<2x512xf32, #tpu.memory_space<vmem>>, vector<2x16xf32>
    tpu.vector_store %arg16[%c0_39, %c64_40], %61 {strides = array<i32>} : memref<2x512xf32, #tpu.memory_space<vmem>>, vector<2x16xf32>,
    %63 = vector.extract_strided_slice %52 {offsets = [10, 0], sizes = [2, 16], strides = [1, 1]} : vector<64x16xf32> to vector<2x16xf32>
    %c0_41 = arith.constant 0 : index
    %c80 = arith.constant 80 : index
    %64 = vector.load %arg16[%c0_41, %c80] : memref<2x512xf32, #tpu.memory_space<vmem>>, vector<2x16xf32>
    tpu.vector_store %arg16[%c0_41, %c80], %63 {strides = array<i32>} : memref<2x512xf32, #tpu.memory_space<vmem>>, vector<2x16xf32>,
    %65 = vector.extract_strided_slice %52 {offsets = [12, 0], sizes = [2, 16], strides = [1, 1]} : vector<64x16xf32> to vector<2x16xf32>
    %c0_42 = arith.constant 0 : index
    %c96_43 = arith.constant 96 : index
    %66 = vector.load %arg16[%c0_42, %c96_43] : memref<2x512xf32, #tpu.memory_space<vmem>>, vector<2x16xf32>
    tpu.vector_store %arg16[%c0_42, %c96_43], %65 {strides = array<i32>} : memref<2x512xf32, #tpu.memory_space<vmem>>, vector<2x16xf32>,
    %67 = vector.extract_strided_slice %52 {offsets = [14, 0], sizes = [2, 16], strides = [1, 1]} : vector<64x16xf32> to vector<2x16xf32>
    %c0_44 = arith.constant 0 : index
    %c112 = arith.constant 112 : index
    %68 = vector.load %arg16[%c0_44, %c112] : memref<2x512xf32, #tpu.memory_space<vmem>>, vector<2x16xf32>
    tpu.vector_store %arg16[%c0_44, %c112], %67 {strides = array<i32>} : memref<2x512xf32, #tpu.memory_space<vmem>>, vector<2x16xf32>,
    %69 = vector.extract_strided_slice %52 {offsets = [16, 0], sizes = [2, 16], strides = [1, 1]} : vector<64x16xf32> to vector<2x16xf32>
    %c0_45 = arith.constant 0 : index
    %c128 = arith.constant 128 : index
    %70 = vector.load %arg16[%c0_45, %c128] : memref<2x512xf32, #tpu.memory_space<vmem>>, vector<2x16xf32>
    tpu.vector_store %arg16[%c0_45, %c128], %69 {strides = array<i32>} : memref<2x512xf32, #tpu.memory_space<vmem>>, vector<2x16xf32>,
    %71 = vector.extract_strided_slice %52 {offsets = [18, 0], sizes = [2, 16], strides = [1, 1]} : vector<64x16xf32> to vector<2x16xf32>
    %c0_46 = arith.constant 0 : index
    %c144 = arith.constant 144 : index
    %72 = vector.load %arg16[%c0_46, %c144] : memref<2x512xf32, #tpu.memory_space<vmem>>, vector<2x16xf32>
    tpu.vector_store %arg16[%c0_46, %c144], %71 {strides = array<i32>} : memref<2x512xf32, #tpu.memory_space<vmem>>, vector<2x16xf32>,
    %73 = vector.extract_strided_slice %52 {offsets = [20, 0], sizes = [2, 16], strides = [1, 1]} : vector<64x16xf32> to vector<2x16xf32>
    %c0_47 = arith.constant 0 : index
    %c160 = arith.constant 160 : index
    %74 = vector.load %arg16[%c0_47, %c160] : memref<2x512xf32, #tpu.memory_space<vmem>>, vector<2x16xf32>
    tpu.vector_store %arg16[%c0_47, %c160], %73 {strides = array<i32>} : memref<2x512xf32, #tpu.memory_space<vmem>>, vector<2x16xf32>,
    %75 = vector.extract_strided_slice %52 {offsets = [22, 0], sizes = [2, 16], strides = [1, 1]} : vector<64x16xf32> to vector<2x16xf32>
    %c0_48 = arith.constant 0 : index
    %c176 = arith.constant 176 : index
    %76 = vector.load %arg16[%c0_48, %c176] : memref<2x512xf32, #tpu.memory_space<vmem>>, vector<2x16xf32>
    tpu.vector_store %arg16[%c0_48, %c176], %75 {strides = array<i32>} : memref<2x512xf32, #tpu.memory_space<vmem>>, vector<2x16xf32>,
    %77 = vector.extract_strided_slice %52 {offsets = [24, 0], sizes = [2, 16], strides = [1, 1]} : vector<64x16xf32> to vector<2x16xf32>
    %c0_49 = arith.constant 0 : index
    %c192_50 = arith.constant 192 : index
    %78 = vector.load %arg16[%c0_49, %c192_50] : memref<2x512xf32, #tpu.memory_space<vmem>>, vector<2x16xf32>
    tpu.vector_store %arg16[%c0_49, %c192_50], %77 {strides = array<i32>} : memref<2x512xf32, #tpu.memory_space<vmem>>, vector<2x16xf32>,
    %79 = vector.extract_strided_slice %52 {offsets = [26, 0], sizes = [2, 16], strides = [1, 1]} : vector<64x16xf32> to vector<2x16xf32>
    %c0_51 = arith.constant 0 : index
    %c208 = arith.constant 208 : index
    %80 = vector.load %arg16[%c0_51, %c208] : memref<2x512xf32, #tpu.memory_space<vmem>>, vector<2x16xf32>
    tpu.vector_store %arg16[%c0_51, %c208], %79 {strides = array<i32>} : memref<2x512xf32, #tpu.memory_space<vmem>>, vector<2x16xf32>,
    %81 = vector.extract_strided_slice %52 {offsets = [28, 0], sizes = [2, 16], strides = [1, 1]} : vector<64x16xf32> to vector<2x16xf32>
    %c0_52 = arith.constant 0 : index
    %c224 = arith.constant 224 : index
    %82 = vector.load %arg16[%c0_52, %c224] : memref<2x512xf32, #tpu.memory_space<vmem>>, vector<2x16xf32>
    tpu.vector_store %arg16[%c0_52, %c224], %81 {strides = array<i32>} : memref<2x512xf32, #tpu.memory_space<vmem>>, vector<2x16xf32>,
    %83 = vector.extract_strided_slice %52 {offsets = [30, 0], sizes = [2, 16], strides = [1, 1]} : vector<64x16xf32> to vector<2x16xf32>
    %c0_53 = arith.constant 0 : index
    %c240 = arith.constant 240 : index
    %84 = vector.load %arg16[%c0_53, %c240] : memref<2x512xf32, #tpu.memory_space<vmem>>, vector<2x16xf32>
    tpu.vector_store %arg16[%c0_53, %c240], %83 {strides = array<i32>} : memref<2x512xf32, #tpu.memory_space<vmem>>, vector<2x16xf32>,
    %85 = vector.extract_strided_slice %52 {offsets = [32, 0], sizes = [2, 16], strides = [1, 1]} : vector<64x16xf32> to vector<2x16xf32>
    %c0_54 = arith.constant 0 : index
    %c256 = arith.constant 256 : index
    %86 = vector.load %arg16[%c0_54, %c256] : memref<2x512xf32, #tpu.memory_space<vmem>>, vector<2x16xf32>
    tpu.vector_store %arg16[%c0_54, %c256], %85 {strides = array<i32>} : memref<2x512xf32, #tpu.memory_space<vmem>>, vector<2x16xf32>,
    %87 = vector.extract_strided_slice %52 {offsets = [34, 0], sizes = [2, 16], strides = [1, 1]} : vector<64x16xf32> to vector<2x16xf32>
    %c0_55 = arith.constant 0 : index
    %c272 = arith.constant 272 : index
    %88 = vector.load %arg16[%c0_55, %c272] : memref<2x512xf32, #tpu.memory_space<vmem>>, vector<2x16xf32>
    tpu.vector_store %arg16[%c0_55, %c272], %87 {strides = array<i32>} : memref<2x512xf32, #tpu.memory_space<vmem>>, vector<2x16xf32>,
    %89 = vector.extract_strided_slice %52 {offsets = [36, 0], sizes = [2, 16], strides = [1, 1]} : vector<64x16xf32> to vector<2x16xf32>
    %c0_56 = arith.constant 0 : index
    %c288 = arith.constant 288 : index
    %90 = vector.load %arg16[%c0_56, %c288] : memref<2x512xf32, #tpu.memory_space<vmem>>, vector<2x16xf32>
    tpu.vector_store %arg16[%c0_56, %c288], %89 {strides = array<i32>} : memref<2x512xf32, #tpu.memory_space<vmem>>, vector<2x16xf32>,
    %91 = vector.extract_strided_slice %52 {offsets = [38, 0], sizes = [2, 16], strides = [1, 1]} : vector<64x16xf32> to vector<2x16xf32>
    %c0_57 = arith.constant 0 : index
    %c304 = arith.constant 304 : index
    %92 = vector.load %arg16[%c0_57, %c304] : memref<2x512xf32, #tpu.memory_space<vmem>>, vector<2x16xf32>
    tpu.vector_store %arg16[%c0_57, %c304], %91 {strides = array<i32>} : memref<2x512xf32, #tpu.memory_space<vmem>>, vector<2x16xf32>,
    %93 = vector.extract_strided_slice %52 {offsets = [40, 0], sizes = [2, 16], strides = [1, 1]} : vector<64x16xf32> to vector<2x16xf32>
    %c0_58 = arith.constant 0 : index
    %c320 = arith.constant 320 : index
    %94 = vector.load %arg16[%c0_58, %c320] : memref<2x512xf32, #tpu.memory_space<vmem>>, vector<2x16xf32>
    tpu.vector_store %arg16[%c0_58, %c320], %93 {strides = array<i32>} : memref<2x512xf32, #tpu.memory_space<vmem>>, vector<2x16xf32>,
    %95 = vector.extract_strided_slice %52 {offsets = [42, 0], sizes = [2, 16], strides = [1, 1]} : vector<64x16xf32> to vector<2x16xf32>
    %c0_59 = arith.constant 0 : index
    %c336 = arith.constant 336 : index
    %96 = vector.load %arg16[%c0_59, %c336] : memref<2x512xf32, #tpu.memory_space<vmem>>, vector<2x16xf32>
    tpu.vector_store %arg16[%c0_59, %c336], %95 {strides = array<i32>} : memref<2x512xf32, #tpu.memory_space<vmem>>, vector<2x16xf32>,
    %97 = vector.extract_strided_slice %52 {offsets = [44, 0], sizes = [2, 16], strides = [1, 1]} : vector<64x16xf32> to vector<2x16xf32>
    %c0_60 = arith.constant 0 : index
    %c352 = arith.constant 352 : index
    %98 = vector.load %arg16[%c0_60, %c352] : memref<2x512xf32, #tpu.memory_space<vmem>>, vector<2x16xf32>
    tpu.vector_store %arg16[%c0_60, %c352], %97 {strides = array<i32>} : memref<2x512xf32, #tpu.memory_space<vmem>>, vector<2x16xf32>,
    %99 = vector.extract_strided_slice %52 {offsets = [46, 0], sizes = [2, 16], strides = [1, 1]} : vector<64x16xf32> to vector<2x16xf32>
    %c0_61 = arith.constant 0 : index
    %c368 = arith.constant 368 : index
    %100 = vector.load %arg16[%c0_61, %c368] : memref<2x512xf32, #tpu.memory_space<vmem>>, vector<2x16xf32>
    tpu.vector_store %arg16[%c0_61, %c368], %99 {strides = array<i32>} : memref<2x512xf32, #tpu.memory_space<vmem>>, vector<2x16xf32>,
    %101 = vector.extract_strided_slice %52 {offsets = [48, 0], sizes = [2, 16], strides = [1, 1]} : vector<64x16xf32> to vector<2x16xf32>
    %c0_62 = arith.constant 0 : index
    %c384 = arith.constant 384 : index
    %102 = vector.load %arg16[%c0_62, %c384] : memref<2x512xf32, #tpu.memory_space<vmem>>, vector<2x16xf32>
    tpu.vector_store %arg16[%c0_62, %c384], %101 {strides = array<i32>} : memref<2x512xf32, #tpu.memory_space<vmem>>, vector<2x16xf32>,
    %103 = vector.extract_strided_slice %52 {offsets = [50, 0], sizes = [2, 16], strides = [1, 1]} : vector<64x16xf32> to vector<2x16xf32>
    %c0_63 = arith.constant 0 : index
    %c400 = arith.constant 400 : index
    %104 = vector.load %arg16[%c0_63, %c400] : memref<2x512xf32, #tpu.memory_space<vmem>>, vector<2x16xf32>
    tpu.vector_store %arg16[%c0_63, %c400], %103 {strides = array<i32>} : memref<2x512xf32, #tpu.memory_space<vmem>>, vector<2x16xf32>,
    %105 = vector.extract_strided_slice %52 {offsets = [52, 0], sizes = [2, 16], strides = [1, 1]} : vector<64x16xf32> to vector<2x16xf32>
    %c0_64 = arith.constant 0 : index
    %c416 = arith.constant 416 : index
    %106 = vector.load %arg16[%c0_64, %c416] : memref<2x512xf32, #tpu.memory_space<vmem>>, vector<2x16xf32>
    tpu.vector_store %arg16[%c0_64, %c416], %105 {strides = array<i32>} : memref<2x512xf32, #tpu.memory_space<vmem>>, vector<2x16xf32>,
    %107 = vector.extract_strided_slice %52 {offsets = [54, 0], sizes = [2, 16], strides = [1, 1]} : vector<64x16xf32> to vector<2x16xf32>
    %c0_65 = arith.constant 0 : index
    %c432 = arith.constant 432 : index
    %108 = vector.load %arg16[%c0_65, %c432] : memref<2x512xf32, #tpu.memory_space<vmem>>, vector<2x16xf32>
    tpu.vector_store %arg16[%c0_65, %c432], %107 {strides = array<i32>} : memref<2x512xf32, #tpu.memory_space<vmem>>, vector<2x16xf32>,
    %109 = vector.extract_strided_slice %52 {offsets = [56, 0], sizes = [2, 16], strides = [1, 1]} : vector<64x16xf32> to vector<2x16xf32>
    %c0_66 = arith.constant 0 : index
    %c448 = arith.constant 448 : index
    %110 = vector.load %arg16[%c0_66, %c448] : memref<2x512xf32, #tpu.memory_space<vmem>>, vector<2x16xf32>
    tpu.vector_store %arg16[%c0_66, %c448], %109 {strides = array<i32>} : memref<2x512xf32, #tpu.memory_space<vmem>>, vector<2x16xf32>,
    %111 = vector.extract_strided_slice %52 {offsets = [58, 0], sizes = [2, 16], strides = [1, 1]} : vector<64x16xf32> to vector<2x16xf32>
    %c0_67 = arith.constant 0 : index
    %c464 = arith.constant 464 : index
    %112 = vector.load %arg16[%c0_67, %c464] : memref<2x512xf32, #tpu.memory_space<vmem>>, vector<2x16xf32>
    tpu.vector_store %arg16[%c0_67, %c464], %111 {strides = array<i32>} : memref<2x512xf32, #tpu.memory_space<vmem>>, vector<2x16xf32>,
    %113 = vector.extract_strided_slice %52 {offsets = [60, 0], sizes = [2, 16], strides = [1, 1]} : vector<64x16xf32> to vector<2x16xf32>
    %c0_68 = arith.constant 0 : index
    %c480 = arith.constant 480 : index
    %114 = vector.load %arg16[%c0_68, %c480] : memref<2x512xf32, #tpu.memory_space<vmem>>, vector<2x16xf32>
    tpu.vector_store %arg16[%c0_68, %c480], %113 {strides = array<i32>} : memref<2x512xf32, #tpu.memory_space<vmem>>, vector<2x16xf32>,
    %115 = vector.extract_strided_slice %52 {offsets = [62, 0], sizes = [2, 16], strides = [1, 1]} : vector<64x16xf32> to vector<2x16xf32>
    %c0_69 = arith.constant 0 : index
    %c496 = arith.constant 496 : index
    %116 = vector.load %arg16[%c0_69, %c496] : memref<2x512xf32, #tpu.memory_space<vmem>>, vector<2x16xf32>
    tpu.vector_store %arg16[%c0_69, %c496], %115 {strides = array<i32>} : memref<2x512xf32, #tpu.memory_space<vmem>>, vector<2x16xf32>,
    %c0_i32_70 = arith.constant 0 : i32
    %117 = tpu.memref_slice %arg19[%c0_i32_70] : memref<2x!tpu.dma_semaphore, #tpu.memory_space<semaphore_mem>> -> memref<1x!tpu.dma_semaphore, #tpu.memory_space<semaphore_mem>>
    %118 = tpu.memref_squeeze %117 : memref<1x!tpu.dma_semaphore, #tpu.memory_space<semaphore_mem>> -> memref<!tpu.dma_semaphore, #tpu.memory_space<semaphore_mem>>
    tpu.wait_dma2 semaphore(%118 : memref<!tpu.dma_semaphore, #tpu.memory_space<semaphore_mem>>) src(%arg7 : memref<512x256xbf16, #tpu.memory_space<any>>) dst(%arg17 : memref<512x256xbf16, #tpu.memory_space<vmem>>)
    %c0_71 = arith.constant 0 : index
    %c0_72 = arith.constant 0 : index
    %119 = vector.load %arg16[%c0_71, %c0_72] : memref<2x512xf32, #tpu.memory_space<vmem>>, vector<2x512xf32>
    %120 = arith.truncf %119 : vector<2x512xf32> to vector<2x512xbf16>
    %c0_73 = arith.constant 0 : index
    %c0_74 = arith.constant 0 : index
    %121 = vector.load %arg17[%c0_73, %c0_74] : memref<512x256xbf16, #tpu.memory_space<vmem>>, vector<512x256xbf16>
    %cst_75 = arith.constant dense<0.000000e+00> : vector<2x256xf32>
    %122 = tpu.matmul %120, %121, %cst_75 {dimension_numbers = #tpu.dot_dimension_numbers<[1], [0], [0], [1], [0, 0, 1, 1], [], []>} : vector<2x512xbf16>, vector<512x256xbf16>, vector<2x256xf32> -> vector<2x256xf32>
    %c0_76 = arith.constant 0 : index
    %c0_77 = arith.constant 0 : index
    %123 = vector.load %arg8[%c0_76, %c0_77] : memref<1x256xf32, #tpu.memory_space<vmem>>, vector<1x256xf32>
    %124 = vector.broadcast %123 : vector<1x256xf32> to vector<2x256xf32>
    %125 = arith.addf %122, %124 : vector<2x256xf32>
    %cst_78 = arith.constant 0.000000e+00 : f32
    %126 = vector.broadcast %cst_78 : f32 to vector<2x256xf32>
    %127 = arith.maximumf %125, %126 : vector<2x256xf32>
    %c1_i32_79 = arith.constant 1 : i32
    %128 = tpu.memref_slice %arg19[%c1_i32_79] : memref<2x!tpu.dma_semaphore, #tpu.memory_space<semaphore_mem>> -> memref<1x!tpu.dma_semaphore, #tpu.memory_space<semaphore_mem>>
    %129 = tpu.memref_squeeze %128 : memref<1x!tpu.dma_semaphore, #tpu.memory_space<semaphore_mem>> -> memref<!tpu.dma_semaphore, #tpu.memory_space<semaphore_mem>>
    tpu.wait_dma2 semaphore(%129 : memref<!tpu.dma_semaphore, #tpu.memory_space<semaphore_mem>>) src(%arg9 : memref<256x128xbf16, #tpu.memory_space<any>>) dst(%arg18 : memref<256x128xbf16, #tpu.memory_space<vmem>>)
    %130 = arith.truncf %127 : vector<2x256xf32> to vector<2x256xbf16>
    %c0_80 = arith.constant 0 : index
    %c0_81 = arith.constant 0 : index
    %131 = vector.load %arg18[%c0_80, %c0_81] : memref<256x128xbf16, #tpu.memory_space<vmem>>, vector<256x128xbf16>
    %cst_82 = arith.constant dense<0.000000e+00> : vector<2x128xf32>
    %132 = tpu.matmul %130, %131, %cst_82 {dimension_numbers = #tpu.dot_dimension_numbers<[1], [0], [0], [1], [0, 0, 1, 1], [], []>} : vector<2x256xbf16>, vector<256x128xbf16>, vector<2x128xf32> -> vector<2x128xf32>
    %c0_83 = arith.constant 0 : index
    %c0_84 = arith.constant 0 : index
    %133 = vector.load %arg10[%c0_83, %c0_84] : memref<1x128xf32, #tpu.memory_space<vmem>>, vector<1x128xf32>
    %134 = vector.broadcast %133 : vector<1x128xf32> to vector<2x128xf32>
    %135 = arith.addf %132, %134 : vector<2x128xf32>
    %cst_85 = arith.constant 0.000000e+00 : f32
    %136 = vector.broadcast %cst_85 : f32 to vector<2x128xf32>
    %137 = arith.maximumf %135, %136 : vector<2x128xf32>
    %138 = arith.truncf %137 : vector<2x128xf32> to vector<2x128xbf16>
    %c0_86 = arith.constant 0 : index
    %c0_87 = arith.constant 0 : index
    %139 = vector.load %arg11[%c0_86, %c0_87] : memref<128x10xbf16, #tpu.memory_space<vmem>>, vector<128x10xbf16>
    %cst_88 = arith.constant dense<0.000000e+00> : vector<2x10xf32>
    %140 = tpu.matmul %138, %139, %cst_88 {dimension_numbers = #tpu.dot_dimension_numbers<[1], [0], [0], [1], [0, 0, 1, 1], [], []>} : vector<2x128xbf16>, vector<128x10xbf16>, vector<2x10xf32> -> vector<2x10xf32>
    %c0_89 = arith.constant 0 : index
    %c0_90 = arith.constant 0 : index
    %141 = vector.load %arg12[%c0_89, %c0_90] : memref<1x10xf32, #tpu.memory_space<vmem>>, vector<1x10xf32>
    %142 = vector.broadcast %141 : vector<1x10xf32> to vector<2x10xf32>
    %143 = arith.addf %140, %142 : vector<2x10xf32>
    %c0_91 = arith.constant 0 : index
    %c0_92 = arith.constant 0 : index
    %144 = vector.load %arg13[%c0_91, %c0_92] : memref<2x10xf32, #tpu.memory_space<vmem>>, vector<2x10xf32>
    tpu.vector_store %arg13[%c0_91, %c0_92], %143 {strides = array<i32>} : memref<2x10xf32, #tpu.memory_space<vmem>>, vector<2x10xf32>,
    return
  }
}

</mosaic_0001>

<bundles_post_ra>
// kernel: _lambda_.1
= control target key start
LH: loop header
LB: loop body
LE: loop exit
PB: predicated region body
PF: predicated region fallthrough
CT: control target
= control target key end

     0   :  { %18 = vsyncpa [#allocation9], 0  ;;  %s4168_s0 = inlined_call_operand.vmem [shape: f32[28,70], index: 0, kind: input, shape index: {}]   ;;  %s4169_s1 = inlined_call_operand.hbm [shape: bf16[192,96], index: 1, kind: input, shape index: {}]   ;;  %s4170_s2 = inlined_call_operand.hbm [shape: f32[67,34], index: 2, kind: input, shape index: {}]   ;;  %s4171_s3 = inlined_call_operand.hbm [shape: f32[96,1], index: 3, kind: input, shape index: {}]   ;;  %s4172_s4 = inlined_call_operand.hbm [shape: bf16[128,288], index: 4, kind: input, shape index: {}]   ;;  %s4173_s5 = inlined_call_operand.hbm [shape: f32[31,16], index: 5, kind: input, shape index: {}]   ;;  %s4174_s6 = inlined_call_operand.hbm [shape: f32[64,1], index: 6, kind: input, shape index: {}]   ;;  %s4175_s7 = inlined_call_operand.hbm [shape: bf16[512,256], index: 7, kind: input, shape index: {}]   ;;  %s4176_s8 = inlined_call_operand.vmem [shape: f32[1,256], index: 8, kind: input, shape index: {}]   ;;  %s4177_s9 = inlined_call_operand.vmem [shape: bf16[256,128], index: 9, kind: input, shape index: {}]   ;;  %s4178_s10 = inlined_call_operand.vmem [shape: f32[1,128], index: 10, kind: input, shape index: {}]   ;;  %s4179_s11 = inlined_call_operand.hbm [shape: bf16[128,10], index: 11, kind: input, shape index: {}]   ;;  %s4180_s12 = inlined_call_operand.vmem [shape: f32[1,10], index: 12, kind: input, shape index: {}]   ;;  %s4181_s13 = inlined_call_operand.hbm [shape: f32[2,10], index: 13, kind: output, shape index: {}]  }
   0x1   :  { %19 = vsyncpa [#allocation12], 0 }
   0x2   :  { %20 = vsyncpa [#allocation15], 0 }
   0x3   :  { %21 = vsyncpa [#allocation18], 0 }
   0x4   :  { %22 = vsyncpa [#allocation10], 0  ;;  %s3626_s25 = smov [#allocation11]  }
   0x5   :  { %s42_s26 = sshll.u32 %s3626_s25, 4  ;;  %s43_s26 = int_to_ptr.vmem [resolvable:$true] %s42_s26 }
   0x6   :  { %s3440_s27 = scalar_lea.vmem %s43_s26, 1152  ;;  %p3445_p1 = scmp.lt.s32.totalorder %s43_s26, %s43_s26 }
   0x7   :  { %p3441_p0 = scmp.ne.s32.totalorder %s43_s26, %s3440_s27  ;;  %p3446_p2 = scmp.lt.s32.totalorder %s3440_s27, %s3440_s27 }
   0x9   :  { %p3447_p3 = por %p3446_p2, %p3445_p1 }
   0xb   :  { %p3448_p4 = pnand %p3447_p3, %p3441_p0 }
   0xd   :  { %3451 = shalt.err (!%p3448_p4)
}
   0xe   :  { %s3627_s28 = smov 128   ;;  %s3628_s29 = smov 8  }
   0xf   :  { %48 = dma.hbm_to_vmem [thread:$0]  %s4170_s2, 1152, %s43_s26, [#allocation12], %s3627_s28, %s3627_s28, %s3628_s29  }
  0x10   :  { %s3629_s15 = smov [#allocation14]  }
  0x11   :  { %s66_s16 = sshll.u32 %s3629_s15, 4  ;;  %s67_s16 = int_to_ptr.vmem [resolvable:$true] %s66_s16 }
  0x12   :  { %s3460_s17 = scalar_lea.vmem %s67_s16, 3072  ;;  %p3465_p6 = scmp.lt.s32.totalorder %s67_s16, %s67_s16 }
  0x13   :  { %p3461_p5 = scmp.ne.s32.totalorder %s67_s16, %s3460_s17  ;;  %p3466_p7 = scmp.lt.s32.totalorder %s3460_s17, %s3460_s17 }
  0x15   :  { %p3467_p8 = por %p3466_p7, %p3465_p6 }
  0x17   :  { %p3468_p9 = pnand %p3467_p8, %p3461_p5 }
  0x19   :  { %3471 = shalt.err (!%p3468_p9)
}
  0x1a   :  { %s3630_s18 = smov 192   ;;  %s3631_s19 = smov 12  }
  0x1b   :  { %72 = dma.hbm_to_vmem [thread:$0]  %s4172_s4, 3072, %s67_s16, [#allocation15], %s3630_s18, %s3630_s18, %s3631_s19  }
  0x1c   :  { %s3632_s22 = smov [#allocation17]   ;;  %s3633_s24 = smov [#allocation8]  }
  0x1d   :  { %s90_s23 = sshll.u32 %s3632_s22, 4  ;;  %s30_s2 = sshll.u32 %s3633_s24, 4  ;;  %s91_s23 = int_to_ptr.vmem [resolvable:$true] %s90_s23  ;;  %s31_s2 = int_to_ptr.vmem [resolvable:$true] %s30_s2 }
  0x1e   :  { %s3480_s25 = scalar_lea.vmem %s91_s23, 1024  ;;  %p3485_p11 = scmp.lt.s32.totalorder %s91_s23, %s91_s23 }
  0x1f   :  { %p3481_p10 = scmp.ne.s32.totalorder %s91_s23, %s3480_s25  ;;  %p3486_p12 = scmp.lt.s32.totalorder %s3480_s25, %s3480_s25 }
  0x21   :  { %p3487_p13 = por %p3486_p12, %p3485_p11 }
  0x23   :  { %p3488_p0 = pnand %p3487_p13, %p3481_p10 }
  0x25   :  { %3491 = shalt.err (!%p3488_p0)
}
  0x26   :  { %96 = dma.hbm_to_vmem [thread:$0]  %s4174_s6, 1024, %s91_s23, [#allocation18], %s3627_s28, %s3627_s28, %s3628_s29  }
  0x27   :  { %s3500_s4 = scalar_lea.vmem %s31_s2, 1536  ;;  %p3505_p2 = scmp.lt.s32.totalorder %s31_s2, %s31_s2 }
  0x28   :  { %p3501_p1 = scmp.ne.s32.totalorder %s31_s2, %s3500_s4  ;;  %p3506_p3 = scmp.lt.s32.totalorder %s3500_s4, %s3500_s4 }
  0x2a   :  { %p3507_p4 = por %p3506_p3, %p3505_p2 }
  0x2c   :  { %p3508_p5 = pnand %p3507_p4, %p3501_p1 }
  0x2e   :  { %3511 = shalt.err (!%p3508_p5)
}
  0x2f   :  { %s3634_s30 = smov 64   ;;  %s3635_s14 = smov 4  }
  0x30   :  { %36 = dma.hbm_to_vmem [thread:$0]  %s4169_s1, 1536, %s31_s2, [#allocation9], %s3634_s30, %s3634_s30, %s3635_s14  }
  0x31   :  { %s3636_s17 = smov [#allocation13]   ;;  %s3637_s19 = smov [#allocation16]  }
  0x32   :  { %s54_s18 = sshll.u32 %s3636_s17, 4  ;;  %s78_s6 = sshll.u32 %s3637_s19, 4  ;;  %s55_s18 = int_to_ptr.vmem [resolvable:$true] %s54_s18  ;;  %s79_s6 = int_to_ptr.vmem [resolvable:$true] %s78_s6 }
  0x33   :  { %s3520_s20 = scalar_lea.vmem %s55_s18, 1536  ;;  %p3525_p7 = scmp.lt.s32.totalorder %s55_s18, %s55_s18 }
  0x34   :  { %p3521_p6 = scmp.ne.s32.totalorder %s55_s18, %s3520_s20  ;;  %p3526_p8 = scmp.lt.s32.totalorder %s3520_s20, %s3520_s20 }
  0x36   :  { %p3527_p9 = por %p3526_p8, %p3525_p7 }
  0x38   :  { %p3528_p10 = pnand %p3527_p9, %p3521_p6 }
  0x3a   :  { %3531 = shalt.err (!%p3528_p10)
}
  0x3b   :  { %60 = dma.hbm_to_vmem [thread:$0]  %s4171_s3, 1536, %s55_s18, [#allocation12], %s3627_s28, %s3627_s28, %s3628_s29  }
  0x3c   :  { %s3540_s1 = scalar_lea.vmem %s79_s6, 512  ;;  %p3545_p12 = scmp.lt.s32.totalorder %s79_s6, %s79_s6 }
  0x3d   :  { %p3541_p11 = scmp.ne.s32.totalorder %s79_s6, %s3540_s1  ;;  %p3546_p13 = scmp.lt.s32.totalorder %s3540_s1, %s3540_s1 }
  0x3f   :  { %p3547_p0 = por %p3546_p13, %p3545_p12 }
  0x41   :  { %p3548_p1 = pnand %p3547_p0, %p3541_p11 }
  0x43   :  { %3551 = shalt.err (!%p3548_p1)
}
  0x44   :  { %84 = dma.hbm_to_vmem [thread:$0]  %s4173_s5, 512, %s79_s6, [#allocation15], %s3627_s28, %s3627_s28, %s3628_s29  }
  0x45   :  { %s3638_s2 = smov [#allocation19]  }
  0x46   :  { %s106_s25 = sshll.u32 %s3638_s2, 4  ;;  %s107_s25 = int_to_ptr.vmem [resolvable:$true] %s106_s25 }
  0x47   :  { %s3560_s26 = scalar_lea.vmem %s107_s25, 1024  ;;  %p3565_p3 = scmp.lt.s32.totalorder %s107_s25, %s107_s25 }
  0x48   :  { %p3561_p2 = scmp.ne.s32.totalorder %s107_s25, %s3560_s26  ;;  %p3566_p4 = scmp.lt.s32.totalorder %s3560_s26, %s3560_s26 }
  0x4a   :  { %p3567_p5 = por %p3566_p4, %p3565_p3 }
  0x4c   :  { %p3568_p6 = pnand %p3567_p5, %p3561_p2 }
  0x4e   :  { %3571 = shalt.err (!%p3568_p6)
}
  0x4f   :  { %112 = dma.hbm_to_vmem [thread:$0]  %s4179_s11, 1024, %s107_s25, [#allocation18], %s3634_s30, %s3634_s30, %s3635_s14  }
  0x50   :  { %3612 = dma.done.wait [#allocation9], 1536  }
  0x51   :  { %3613 = vsyncadd [#allocation9], 4294965760 }
  0x52   :  { %3614 = dma.done.wait [#allocation12], 2688  }
  0x53   :  { %3615 = vsyncadd [#allocation12], 4294964608 }
  0x54   :  { %3616 = dma.done.wait [#allocation15], 3584  }
  0x55   :  { %3617 = vsyncadd [#allocation15], 4294963712 }
  0x56   :  { %3618 = dma.done.wait [#allocation18], 2048  }
  0x57   :  { %3619 = vsyncadd [#allocation18], 4294965248  ;;  %s3639_s5 = smov [#allocation5]  }
  0x58   :  { %s144_s28 = sshll.u32 %s3639_s5, 4  ;;  %s145_s28 = int_to_ptr.vmem [resolvable:$true] %s144_s28 }
  0x59   :  { %s3580_s29 = scalar_lea.vmem %s145_s28, 8192  ;;  %p3585_p8 = scmp.lt.s32.totalorder %s145_s28, %s145_s28 }
  0x5a   :  { %p3581_p7 = scmp.ne.s32.totalorder %s145_s28, %s3580_s29  ;;  %p3586_p9 = scmp.lt.s32.totalorder %s3580_s29, %s3580_s29 }
  0x5c   :  { %p3587_p10 = por %p3586_p9, %p3585_p8 }
  0x5e   :  { %p3588_p11 = pnand %p3587_p10, %p3581_p7 }
  0x60   :  { %3591 = shalt.err (!%p3588_p11)  }
  0x61   :  { %147 = dma.hbm_to_vmem [thread:$0]  %s4175_s7, 8192, %s145_s28, [#allocation7]  ;;  %v182_v0 = vld [vmem:[%s4177_s9] sm:$0xff]  ;;  %v184_v1 = vld [vmem:[%s4177_s9 + $0x8] sm:$0xff]  ;;  %v186_v2 = vld [vmem:[%s4177_s9 + $0x10] sm:$0xff]  ;;  %vm226_vm0 = vcmask 556032  }
  0x62   :  { %183 = vst [vmem:[#allocation6] sm:$0xff] %v182_v0  ;;  %185 = vst [vmem:[#allocation6 + $0x8] sm:$0xff] %v184_v1  ;;  %v188_v3 = vld [vmem:[%s4177_s9 + $0x18] sm:$0xff]  ;;  %v190_v4 = vld [vmem:[%s4177_s9 + $0x20] sm:$0xff]  ;;  %vm242_vm1 = vcmask 551936   ;;  %v3640_v18 = vmov 0.0  }
  0x63   :  { %187 = vst [vmem:[#allocation6 + $0x10] sm:$0xff] %v186_v2  ;;  %v192_v5 = vld [vmem:[%s4177_s9 + $0x28] sm:$0xff]  ;;  %189 = vst [vmem:[#allocation6 + $0x18] sm:$0xff] %v188_v3  ;;  %v194_v6 = vld [vmem:[%s4177_s9 + $0x30] sm:$0xff]  ;;  %s3641_s23 = smov 126  }
  0x64   :  { %191 = vst [vmem:[#allocation6 + $0x20] sm:$0xff] %v190_v4  ;;  %193 = vst [vmem:[#allocation6 + $0x28] sm:$0xff] %v192_v5  ;;  %v196_v7 = vld [vmem:[%s4177_s9 + $0x38] sm:$0xff]  ;;  %v198_v8 = vld [vmem:[%s4177_s9 + $0x40] sm:$0xff] }
  0x65   :  { %195 = vst [vmem:[#allocation6 + $0x30] sm:$0xff] %v194_v6  ;;  %197 = vst [vmem:[#allocation6 + $0x38] sm:$0xff] %v196_v7  ;;  %v200_v9 = vld [vmem:[%s4177_s9 + $0x48] sm:$0xff]  ;;  %v202_v10 = vld [vmem:[%s4177_s9 + $0x50] sm:$0xff] }
  0x66   :  { %199 = vst [vmem:[#allocation6 + $0x40] sm:$0xff] %v198_v8  ;;  %v204_v11 = vld [vmem:[%s4177_s9 + $0x58] sm:$0xff]  ;;  %201 = vst [vmem:[#allocation6 + $0x48] sm:$0xff] %v200_v9  ;;  %v206_v12 = vld [vmem:[%s4177_s9 + $0x60] sm:$0xff] }
  0x67   :  { %203 = vst [vmem:[#allocation6 + $0x50] sm:$0xff] %v202_v10  ;;  %205 = vst [vmem:[#allocation6 + $0x58] sm:$0xff] %v204_v11  ;;  %v208_v13 = vld [vmem:[%s4177_s9 + $0x68] sm:$0xff]  ;;  %v210_v14 = vld [vmem:[%s4177_s9 + $0x70] sm:$0xff] }
  0x68   :  { %207 = vst [vmem:[#allocation6 + $0x60] sm:$0xff] %v206_v12  ;;  %209 = vst [vmem:[#allocation6 + $0x68] sm:$0xff] %v208_v13  ;;  %v212_v15 = vld [vmem:[%s4177_s9 + $0x78] sm:$0xff]  ;;  %v224_v16 = vld [vmem:[%s4168_s0 + $0x10] sm:$0xff] }
  0x69   :  { %211 = vst [vmem:[#allocation6 + $0x70] sm:$0xff] %v210_v14  ;;  %213 = vst [vmem:[#allocation6 + $0x78] sm:$0xff] %v212_v15  ;;  %v222_v17 = vld [vmem:[%s4168_s0] sm:$0xff]  ;;  %268 = vrot.lane.b32.xlu0 %v224_v16, %s3641_s23  ;;  %v225_v19 = vld [vmem:[%s4168_s0 + $0x18] sm:$0xf] }
  0x6a   :  { %229 = vst.msk [vmem:[#allocation2 + $0x10] sm:$0xff] %vm226_vm0, %v3640_v18  ;;  %227 = vst.msk [vmem:[#allocation2] sm:$0xff] %vm226_vm0, %v3640_v18  ;;  %264 = vrot.lane.b32.xlu1 %v222_v17, %s3641_s23  ;;  %v223_v20 = vld [vmem:[%s4168_s0 + $0x8] sm:$0xff] }
  0x6b   :  { %228 = vst.msk [vmem:[#allocation2 + $0x8] sm:$0xff] %vm226_vm0, %v3640_v18  ;;  %230 = vst.msk [vmem:[#allocation2 + $0x18] sm:$0xff] %vm226_vm0, %v3640_v18 }
  0x6c   :  { %231 = vst.msk [vmem:[#allocation2 + $0x20] sm:$0xff] %vm226_vm0, %v3640_v18  ;;  %232 = vst.msk [vmem:[#allocation2 + $0x28] sm:$0xff] %vm226_vm0, %v3640_v18 }
  0x6d   :  { %233 = vst.msk [vmem:[#allocation2 + $0x30] sm:$0xff] %vm226_vm0, %v3640_v18  ;;  %234 = vst.msk [vmem:[#allocation2 + $0x38] sm:$0xff] %vm226_vm0, %v3640_v18 }
  0x6e   :  { %235 = vst.msk [vmem:[#allocation2 + $0x40] sm:$0xff] %vm226_vm0, %v3640_v18  ;;  %236 = vst.msk [vmem:[#allocation2 + $0x48] sm:$0xff] %vm226_vm0, %v3640_v18 }
  0x6f   :  { %237 = vst.msk [vmem:[#allocation2 + $0x50] sm:$0xff] %vm226_vm0, %v3640_v18  ;;  %238 = vst.msk [vmem:[#allocation2 + $0x58] sm:$0xff] %vm226_vm0, %v3640_v18 }
  0x70   :  { %241 = vst.msk [vmem:[#allocation2 + $0x10] sm:$0xff] %vm226_vm0, %v224_v16  ;;  %239 = vst.msk [vmem:[#allocation2] sm:$0xff] %vm226_vm0, %v222_v17 }
  0x71   :  { %243 = vst.msk [vmem:[#allocation2 + $0x18] sm:$0xf] %vm242_vm1, %v225_v19 }
  0x72   :  { %240 = vst.msk [vmem:[#allocation2 + $0x8] sm:$0xff] %vm226_vm0, %v223_v20 }
  0x73   :  { %221 = vsyncadd [#allocation7 + $0x1], 2048  ;;  %270 = vrot.lane.b32.xlu0 %v225_v19, %s3641_s23  ;;  %266 = vrot.lane.b32.xlu1 %v223_v20, %s3641_s23  ;;  %s3642_s26 = smov 127   ;;  %v3267_v21 = vld [vmem:[#allocation8] sm:$0xff]   ;;  %vm382_vm2 = vcmask 785408   ;;  %v3268_v48 = vld [vmem:[#allocation8 + $0x8] sm:$0xff]  }
  0x74   :  { %3118 = vmatprep.mubr.msk.bf16.mxu0 %vm382_vm2, %v3267_v21  ;;  %v3269_v49 = vld [vmem:[#allocation8 + $0x10] sm:$0xff]   ;;  %v3270_v50 = vld [vmem:[#allocation8 + $0x18] sm:$0xff]   ;;  %v3271_v51 = vld [vmem:[#allocation8 + $0x20] sm:$0xff]   ;;  %vm738_vm3 = vcmask 1042432   ;;  %vm701_vm4 = vcmask 547840   ;;  %vm879_vm5 = vcmask 261120  }
  0x75   :  { %v3272_v52 = vld [vmem:[#allocation8 + $0x28] sm:$0xff]   ;;  %v3273_v53 = vld [vmem:[#allocation8 + $0x30] sm:$0xff]   ;;  %v3274_v54 = vld [vmem:[#allocation8 + $0x38] sm:$0xff]   ;;  %vm1549_vm6 = vcmask 1046528   ;;  %vm1524_vm7 = vcmask 252928   ;;  %vm1666_vm8 = vcmask 123904  }
  0x76   :  { %v3275_v55 = vld [vmem:[#allocation8 + $0x40] sm:$0xff]   ;;  %v3276_v56 = vld [vmem:[#allocation8 + $0x48] sm:$0xff]   ;;  %v3277_v57 = vld [vmem:[#allocation8 + $0x50] sm:$0xff]   ;;  %s3645_s0 = smov 80   ;;  %s3646_s3 = smov 96   ;;  %vm1680_vm9 = vcmask 255104  }
  0x77   :  { %252 = vrot.lane.b32.xlu0 %v224_v16, %s3642_s26  ;;  %254 = vrot.lane.b32.xlu1 %v225_v19, %s3642_s26  ;;  %v306_v42 = vld [vmem:[#allocation2 + $0x10] sm:$0xff]  ;;  %v304_v45 = vld [vmem:[#allocation2] sm:$0xff]  ;;  %v628_v59 = vld [vmem:[#allocation11 + $0x40] sm:$0x7]  ;;  %s3647_s27 = smov 16   ;;  %s3648_s5 = smov 32  }
  0x78   :  { %v307_v43 = vld [vmem:[#allocation2 + $0x18] sm:$0xff]  ;;  %v3278_v58 = vld [vmem:[#allocation8 + $0x58] sm:$0xff]   ;;  %3142 = vmatprep.subr.msk.mxu1 %vm738_vm3, %v628_v59  ;;  %v625_v62 = vld [vmem:[#allocation11 + $0x28] sm:$0xff]  ;;  %s3649_s28 = smov 112   ;;  %s3650_s29 = smov 48   ;;  %vm1693_vm10 = vcmask 386304  }
  0x79   :  { %v317_v44 = vpack.c.bf16 %v307_v43, %v306_v42  ;;  %v305_v46 = vld [vmem:[#allocation2 + $0x8] sm:$0xff]  ;;  %v627_v60 = vld [vmem:[#allocation11 + $0x38] sm:$0xff]  ;;  %3143 = vmatpush3.msk.msra.mxu1 %vm738_vm3, %v628_v59  ;;  %v626_v61 = vld [vmem:[#allocation11 + $0x30] sm:$0xff]  ;;  %vm1699_vm11 = vcmask 517504   ;;  %vm1712_vm12 = vcmask 648704   ;;  %vm1718_vm13 = vcmask 779904  }
  0x7a   :  { %v316_v47 = vpack.c.bf16 %v305_v46, %v304_v45  ;;  %3144 = vmatprep.subr.mxu1 %v627_v60  ;;  %v624_v63 = vld [vmem:[#allocation11 + $0x20] sm:$0xff]  ;;  %v623_v0 = vld [vmem:[#allocation11 + $0x18] sm:$0xff]  ;;  %v622_v9 = vld [vmem:[#allocation11 + $0x10] sm:$0xff]  ;;  %vm1731_vm14 = vcmask 911104   ;;  %vm1737_vm15 = vcmask 1042304  }
  0x7b   :  { %248 = vrot.lane.b32.xlu0 %v222_v17, %s3642_s26  ;;  %250 = vrot.lane.b32.xlu1 %v223_v20, %s3642_s26  ;;  %v621_v11 = vld [vmem:[#allocation11 + $0x8] sm:$0xff]  ;;  %v620_v13 = vld [vmem:[#allocation11] sm:$0xff]  ;;  %v631_v45 = vld [vmem:[#allocation13 + $0x10] sm:$0xff] }
  0x7c   :  { %3145 = vmatpush3.msra.mxu1 %v627_v60  ;;  %v636_v43 = vld [vmem:[#allocation13 + $0x38] sm:$0xff]  ;;  %v634_v46 = vld [vmem:[#allocation13 + $0x28] sm:$0xff] }
  0x7d   :  { %3146 = vmatprep.subr.mxu1 %v626_v61 }
  0x7e   :  { %3147 = vmatpush3.msra.mxu1 %v626_v61 }
  0x7f   :  { %3148 = vmatprep.subr.mxu1 %v625_v62 }
  0x80   :  { %3149 = vmatpush3.msra.mxu1 %v625_v62 }
  0x81   :  { %3150 = vmatprep.subr.mxu1 %v624_v63 }
  0x82   :  { %3151 = vmatpush3.msra.mxu1 %v624_v63 }
  0x83   :  { %3152 = vmatprep.subr.mxu1 %v623_v0 }
  0x84   :  { %3153 = vmatpush3.msra.mxu1 %v623_v0 }
  0x85   :  { %3154 = vmatprep.subr.mxu1 %v622_v9 }
  0x86   :  { %3155 = vmatpush3.msra.mxu1 %v622_v9 }
  0x87   :  { %3156 = vmatprep.subr.mxu1 %v621_v11 }
  0x88   :  { %3157 = vmatpush3.msra.mxu1 %v621_v11 }
  0x89   :  { %3158 = vmatprep.subr.mxu1 %v620_v13 }
  0x8a   :  { %3159 = vmatpush3.msra.mxu1 %v620_v13 }
  0xdb   :  { %v269_v22 = vpop.permute.xlu0 %268 }
  0xdc   :  { %v265_v23 = vpop.permute.xlu1 %264  ;;  %278 = vst.msk [vmem:[#allocation2 + $0x50] sm:$0xff] %vm226_vm0, %v269_v22 }
  0xdd   :  { %276 = vst.msk [vmem:[#allocation2 + $0x40] sm:$0xff] %vm226_vm0, %v265_v23 }
  0xe3   :  { %v314_v28 = vld [vmem:[#allocation2 + $0x50] sm:$0xff] }
  0xe4   :  { %v312_v32 = vld [vmem:[#allocation2 + $0x40] sm:$0xff] }
  0xe5   :  { %v271_v24 = vpop.permute.xlu0 %270  ;;  %v267_v25 = vpop.permute.xlu1 %266 }
  0xe6   :  { %279 = vst.msk [vmem:[#allocation2 + $0x58] sm:$0xf] %vm242_vm1, %v271_v24 }
  0xe7   :  { %277 = vst.msk [vmem:[#allocation2 + $0x48] sm:$0xff] %vm226_vm0, %v267_v25 }
  0xe9   :  { %v253_v26 = vpop.permute.xlu0 %252  ;;  %v255_v27 = vpop.permute.xlu1 %254 }
  0xea   :  { %262 = vst.msk [vmem:[#allocation2 + $0x30] sm:$0xff] %vm226_vm0, %v253_v26 }
  0xeb   :  { %263 = vst.msk [vmem:[#allocation2 + $0x38] sm:$0xf] %vm242_vm1, %v255_v27 }
  0xed   :  { %v315_v29 = vld [vmem:[#allocation2 + $0x58] sm:$0xff]  ;;  %v249_v30 = vpop.permute.xlu0 %248  ;;  %v251_v31 = vpop.permute.xlu1 %250 }
  0xee   :  { %v313_v33 = vld [vmem:[#allocation2 + $0x48] sm:$0xff]  ;;  %v321_v34 = vpack.c.bf16 %v315_v29, %v314_v28  ;;  %260 = vst.msk [vmem:[#allocation2 + $0x20] sm:$0xff] %vm226_vm0, %v249_v30  ;;  %261 = vst.msk [vmem:[#allocation2 + $0x28] sm:$0xff] %vm226_vm0, %v251_v31 }
  0xef   :  { %v320_v35 = vpack.c.bf16 %v313_v33, %v312_v32 }
  0xf0   :  { %3106 = vmatprep.subr.bf16.mxu0 %v321_v34 }
  0xf1   :  { %3107 = vmatpush3.bf16.msra.mxu0 %v321_v34  ;;  %v310_v36 = vld [vmem:[#allocation2 + $0x30] sm:$0xff] }
  0xf2   :  { %v311_v37 = vld [vmem:[#allocation2 + $0x38] sm:$0xff]  ;;  %3108 = vmatprep.subr.bf16.mxu0 %v320_v35 }
  0xf3   :  { %v319_v38 = vpack.c.bf16 %v311_v37, %v310_v36  ;;  %v3643_v36 = vmov 0  }
  0xf4   :  { %3266 = vset.pattern.permute.xlu1 %v3643_v36  ;;  %3265 = vset.pattern.permute.xlu0 %v3643_v36 }
  0xf5   :  { %3109 = vmatpush3.bf16.msra.mxu0 %v320_v35  ;;  %v308_v39 = vld [vmem:[#allocation2 + $0x20] sm:$0xff]  ;;  %v309_v40 = vld [vmem:[#allocation2 + $0x28] sm:$0xff] }
  0xf6   :  { %3110 = vmatprep.subr.bf16.mxu0 %v319_v38  ;;  %v318_v41 = vpack.c.bf16 %v309_v40, %v308_v39 }
  0xf9   :  { %3111 = vmatpush3.bf16.msra.mxu0 %v319_v38 }
  0xfa   :  { %3112 = vmatprep.subr.bf16.mxu0 %v318_v41 }
  0xfd   :  { %3113 = vmatpush3.bf16.msra.mxu0 %v318_v41  ;;  %v635_v41 = vld [vmem:[#allocation13 + $0x30] sm:$0xff] }
  0xfe   :  { %3114 = vmatprep.subr.bf16.mxu0 %v317_v44 }
 0x101   :  { %3115 = vmatpush3.bf16.msra.mxu0 %v317_v44  ;;  %v632_v44 = vld [vmem:[#allocation13 + $0x18] sm:$0xff] }
 0x102   :  { %3116 = vmatprep.subr.bf16.mxu0 %v316_v47 }
 0x105   :  { %3117 = vmatpush3.bf16.msra.mxu0 %v316_v47  ;;  %v633_v47 = vld [vmem:[#allocation13 + $0x20] sm:$0xff] }
 0x108   :  { %3119 = vmatmul.mubr.msk.bf16.vlgmr.msra.gmra.mxu0 %vm382_vm2, %v3268_v48  ;;  %v630_v48 = vld [vmem:[#allocation13 + $0x8] sm:$0xff] }
 0x109   :  { %3122 = vmatprep.mubr.msk.bf16.mxu0 %vm382_vm2, %v3269_v49  ;;  %v629_v49 = vld [vmem:[#allocation13] sm:$0xff] }
 0x110   :  { %3123 = vmatmul.mubr.msk.bf16.gmra.mxu0 %vm382_vm2, %v3270_v50  ;;  %v640_v50 = vld [vmem:[#allocation13 + $0x58] sm:$0xff] }
 0x111   :  { %3126 = vmatprep.mubr.msk.bf16.mxu0 %vm382_vm2, %v3271_v51  ;;  %v639_v51 = vld [vmem:[#allocation13 + $0x50] sm:$0xff] }
 0x118   :  { %3127 = vmatmul.mubr.msk.bf16.gmra.mxu0 %vm382_vm2, %v3272_v52  ;;  %v638_v52 = vld [vmem:[#allocation13 + $0x48] sm:$0xff] }
 0x119   :  { %3130 = vmatprep.mubr.msk.bf16.mxu0 %vm382_vm2, %v3273_v53  ;;  %v637_v53 = vld [vmem:[#allocation13 + $0x40] sm:$0xff] }
 0x120   :  { %3131 = vmatmul.mubr.msk.bf16.gmra.mxu0 %vm382_vm2, %v3274_v54 }
 0x121   :  { %3134 = vmatprep.mubr.msk.bf16.mxu0 %vm382_vm2, %v3275_v55 }
 0x128   :  { %3135 = vmatmul.mubr.msk.bf16.gmra.mxu0 %vm382_vm2, %v3276_v56 }
 0x129   :  { %3138 = vmatprep.mubr.msk.bf16.mxu0 %vm382_vm2, %v3277_v57 }
 0x130   :  { %3139 = vmatmul.mubr.msk.bf16.gmra.mxu0 %vm382_vm2, %v3278_v58 }
 0x1c8   :  { %v3120_v1 = vpop.f32.mrf.mxu0 }
 0x1ca   :  { %v453_v2 = vpop.f32.mrf.mxu0 }
 0x1cc   :  { %v3121_v3 = vpop.f32.mrf.mxu0 }
 0x1ce   :  { %v456_v4 = vpop.f32.mrf.mxu0 }
 0x1d0   :  { %v3124_v5 = vpop.f32.mrf.mxu0 }
 0x1d2   :  { %v469_v6 = vpop.f32.mrf.mxu0 }
 0x1d4   :  { %v3125_v7 = vpop.f32.mrf.mxu0 }
 0x1d6   :  { %v472_v8 = vpop.f32.mrf.mxu0 }
 0x1d8   :  { %v3128_v10 = vpop.f32.mrf.mxu0 }
 0x1da   :  { %v485_v12 = vpop.f32.mrf.mxu0 }
 0x1dc   :  { %v3129_v14 = vpop.f32.mrf.mxu0 }
 0x1de   :  { %v488_v15 = vpop.f32.mrf.mxu0 }
 0x1e0   :  { %v3132_v16 = vpop.f32.mrf.mxu0 }
 0x1e1   :  { %v3885_v22 = vmax.f32 %v3120_v1, %v3132_v16 }
 0x1e2   :  { %v501_v17 = vpop.f32.mrf.mxu0 }
 0x1e3   :  { %v3881_v19 = vmax.f32 %v453_v2, %v501_v17 }
 0x1e4   :  { %v3133_v20 = vpop.f32.mrf.mxu0 }
 0x1e5   :  { %572 = vrot.lane.b32.xlu0 %v3881_v19, %s3642_s26  ;;  %v3893_v26 = vmax.f32 %v3121_v3, %v3133_v20 }
 0x1e6   :  { %v504_v21 = vpop.f32.mrf.mxu0 }
 0x1e7   :  { %v3887_v23 = vmax.f32 %v456_v4, %v504_v21 }
 0x1e8   :  { %v3136_v24 = vpop.f32.mrf.mxu0 }
 0x1e9   :  { %576 = vrot.lane.b32.xlu0 %v3885_v22, %s3642_s26  ;;  %574 = vrot.lane.b32.xlu1 %v3887_v23, %s3642_s26  ;;  %v3901_v30 = vmax.f32 %v3124_v5, %v3136_v24 }
 0x1ea   :  { %v517_v25 = vpop.f32.mrf.mxu0 }
 0x1eb   :  { %v3895_v27 = vmax.f32 %v469_v6, %v517_v25 }
 0x1ec   :  { %v3137_v28 = vpop.f32.mrf.mxu0 }
 0x1ed   :  { %578 = vrot.lane.b32.xlu1 %v3893_v26, %s3642_s26  ;;  %580 = vrot.lane.b32.xlu0 %v3895_v27, %s3642_s26  ;;  %v3909_v34 = vmax.f32 %v3125_v7, %v3137_v28 }
 0x1ee   :  { %v520_v29 = vpop.f32.mrf.mxu0 }
 0x1ef   :  { %v3903_v31 = vmax.f32 %v472_v8, %v520_v29 }
 0x1f0   :  { %v3140_v32 = vpop.f32.mrf.mxu0 }
 0x1f1   :  { %584 = vrot.lane.b32.xlu0 %v3901_v30, %s3642_s26  ;;  %582 = vrot.lane.b32.xlu1 %v3903_v31, %s3642_s26  ;;  %v3917_v39 = vmax.f32 %v3128_v10, %v3140_v32 }
 0x1f2   :  { %v533_v33 = vpop.f32.mrf.mxu0 }
 0x1f3   :  { %v3911_v35 = vmax.f32 %v485_v12, %v533_v33 }
 0x1f4   :  { %v3141_v37 = vpop.f32.mrf.mxu0 }
 0x1f5   :  { %586 = vrot.lane.b32.xlu1 %v3909_v34, %s3642_s26  ;;  %588 = vrot.lane.b32.xlu0 %v3911_v35, %s3642_s26  ;;  %v559_v42 = vmax.f32 %v3129_v14, %v3141_v37 }
 0x1f6   :  { %v536_v38 = vpop.f32.mrf.mxu0 }
 0x1f7   :  { %v557_v40 = vmax.f32 %v488_v15, %v536_v38 }
 0x1f9   :  { %592 = vrot.lane.b32.xlu0 %v3917_v39, %s3642_s26  ;;  %590 = vrot.lane.b32.xlu1 %v557_v40, %s3642_s26 }
 0x1fd   :  { %594 = vrot.lane.b32.xlu1 %v559_v42, %s3642_s26  ;;  %673 = vperm.xlu0 %3265, %v635_v41  }
 0x201   :  { %678 = vperm.xlu1 %3266, %v636_v43   ;;  %658 = vperm.xlu0 %3265, %v632_v44  }
 0x205   :  { %653 = vperm.xlu1 %3266, %v631_v45   ;;  %668 = vperm.xlu0 %3265, %v634_v46  }
 0x209   :  { %663 = vperm.xlu1 %3266, %v633_v47   ;;  %648 = vperm.xlu0 %3265, %v630_v48  }
 0x20d   :  { %643 = vperm.xlu1 %3266, %v629_v49   ;;  %698 = vperm.xlu0 %3265, %v640_v50  }
 0x211   :  { %693 = vperm.xlu1 %3266, %v639_v51   ;;  %688 = vperm.xlu0 %3265, %v638_v52  }
 0x215   :  { %683 = vperm.xlu1 %3266, %v637_v53  }
 0x257   :  { %v573_v54 = vpop.permute.xlu0 %572 }
 0x258   :  { %v608_v55 = vmax.f32 %v3881_v19, %v573_v54 }
 0x25a   :  { %3160 = vmatprep.mubr.msk.f32.mxu1 %vm701_vm4, %v608_v55 }
 0x25b   :  { %v577_v56 = vpop.permute.xlu0 %576  ;;  %v575_v57 = vpop.permute.xlu1 %574 }
 0x25c   :  { %v610_v58 = vmax.f32 %v3885_v22, %v577_v56  ;;  %v609_v59 = vmax.f32 %v3887_v23, %v575_v57 }
 0x25e   :  { %3161 = vmatmul.mubr.msk.f32.vlgmr.msra.gmra.mxu1 %vm701_vm4, %v609_v59 }
 0x25f   :  { %3163 = vmatprep.mubr.msk.f32.mxu1 %vm701_vm4, %v610_v58  ;;  %v579_v60 = vpop.permute.xlu1 %578  ;;  %v581_v61 = vpop.permute.xlu0 %580 }
 0x260   :  { %v611_v62 = vmax.f32 %v3893_v26, %v579_v60  ;;  %v612_v63 = vmax.f32 %v3895_v27, %v581_v61 }
 0x262   :  { %3164 = vmatmul.mubr.msk.f32.gmra.mxu1 %vm701_vm4, %v611_v62 }
 0x263   :  { %3166 = vmatprep.mubr.msk.f32.mxu1 %vm701_vm4, %v612_v63  ;;  %v585_v0 = vpop.permute.xlu0 %584  ;;  %v583_v1 = vpop.permute.xlu1 %582  ;;  %v3281_v63 = vld [vmem:[#allocation14 + $0x4] ss:$12 sps:$4 sm:$0xff]  }
 0x264   :  { %v614_v2 = vmax.f32 %v3901_v30, %v585_v0  ;;  %v613_v3 = vmax.f32 %v3903_v31, %v583_v1  ;;  %v3288_v0 = vld [vmem:[#allocation14 + $0x8] ss:$12 sps:$4 sm:$0xff]  }
 0x265   :  { %3182 = vmatprep.mubr.msk.bf16.mxu0 %vm879_vm5, %v3288_v0 }
 0x266   :  { %3167 = vmatmul.mubr.msk.f32.gmra.mxu1 %vm701_vm4, %v613_v3 }
 0x267   :  { %3169 = vmatprep.mubr.msk.f32.mxu1 %vm701_vm4, %v614_v2  ;;  %v587_v4 = vpop.permute.xlu1 %586  ;;  %v589_v5 = vpop.permute.xlu0 %588 }
 0x268   :  { %v615_v6 = vmax.f32 %v3909_v34, %v587_v4  ;;  %v616_v7 = vmax.f32 %v3911_v35, %v589_v5 }
 0x26a   :  { %3170 = vmatmul.mubr.msk.f32.gmra.mxu1 %vm701_vm4, %v615_v6 }
 0x26b   :  { %3172 = vmatprep.mubr.msk.f32.mxu1 %vm701_vm4, %v616_v7  ;;  %v593_v8 = vpop.permute.xlu0 %592  ;;  %v591_v9 = vpop.permute.xlu1 %590 }
 0x26c   :  { %v618_v10 = vmax.f32 %v3917_v39, %v593_v8  ;;  %v617_v11 = vmax.f32 %v557_v40, %v591_v9 }
 0x26e   :  { %3173 = vmatmul.mubr.msk.f32.gmra.mxu1 %vm701_vm4, %v617_v11 }
 0x26f   :  { %3175 = vmatprep.mubr.msk.f32.mxu1 %vm701_vm4, %v618_v10  ;;  %v595_v12 = vpop.permute.xlu1 %594 }
 0x270   :  { %v619_v13 = vmax.f32 %v559_v42, %v595_v12 }
 0x272   :  { %3176 = vmatmul.mubr.msk.f32.gmra.mxu1 %vm701_vm4, %v619_v13 }
 0x273   :  { %1262 = vmatprep.mubr.bf16.mxu1 %v3281_v63 }
 0x278   :  { %v674_v14 = vpop.permute.xlu0 %673 }
 0x27c   :  { %v679_v15 = vpop.permute.xlu1 %678  ;;  %v659_v16 = vpop.permute.xlu0 %658 }
 0x280   :  { %v654_v17 = vpop.permute.xlu1 %653  ;;  %v669_v19 = vpop.permute.xlu0 %668 }
 0x284   :  { %v664_v20 = vpop.permute.xlu1 %663  ;;  %v649_v21 = vpop.permute.xlu0 %648 }
 0x288   :  { %v644_v24 = vpop.permute.xlu1 %643  ;;  %v699_v37 = vpop.permute.xlu0 %698 }
 0x28c   :  { %v694_v41 = vpop.permute.xlu1 %693  ;;  %v689_v48 = vpop.permute.xlu0 %688 }
 0x290   :  { %v684_v52 = vpop.permute.xlu1 %683 }
 0x31e   :  { %v3162_v22 = vpop.f32.mrf.mxu1 }
 0x31f   :  { %v814_v23 = vadd.f32 %v3162_v22, %v649_v21 }
 0x320   :  { %v808_v25 = vpop.f32.mrf.mxu1 }
 0x321   :  { %v868_v26 = vmax.f32 %v814_v23, 0.0  ;;  %v809_v27 = vadd.f32 %v808_v25, %v644_v24 }
 0x322   :  { %v3165_v28 = vpop.f32.mrf.mxu1 }
 0x323   :  { %881 = vst.msk [vmem:[#allocation3 + $0x8] sm:$0xff] %vm879_vm5, %v868_v26  ;;  %v867_v29 = vmax.f32 %v809_v27, 0.0  ;;  %v824_v30 = vadd.f32 %v3165_v28, %v659_v16 }
 0x324   :  { %v818_v31 = vpop.f32.mrf.mxu1 }
 0x325   :  { %880 = vst.msk [vmem:[#allocation3] sm:$0xff] %vm879_vm5, %v867_v29  ;;  %v870_v32 = vmax.f32 %v824_v30, 0.0  ;;  %v819_v33 = vadd.f32 %v818_v31, %v654_v17 }
 0x326   :  { %v3168_v34 = vpop.f32.mrf.mxu1 }
 0x327   :  { %883 = vst.msk [vmem:[#allocation3 + $0x18] sm:$0xff] %vm879_vm5, %v870_v32  ;;  %v869_v35 = vmax.f32 %v819_v33, 0.0  ;;  %v834_v36 = vadd.f32 %v3168_v34, %v669_v19  ;;  %910 = vrot.lane.b32.xlu0 %v870_v32, %s3642_s26 }
 0x328   :  { %v828_v38 = vpop.f32.mrf.mxu1 }
 0x329   :  { %882 = vst.msk [vmem:[#allocation3 + $0x10] sm:$0xff] %vm879_vm5, %v869_v35  ;;  %v872_v39 = vmax.f32 %v834_v36, 0.0  ;;  %v829_v40 = vadd.f32 %v828_v38, %v664_v20  ;;  %908 = vrot.lane.b32.xlu1 %v869_v35, %s3642_s26 }
 0x32a   :  { %v3171_v42 = vpop.f32.mrf.mxu1 }
 0x32b   :  { %885 = vst.msk [vmem:[#allocation3 + $0x28] sm:$0xff] %vm879_vm5, %v872_v39  ;;  %v871_v43 = vmax.f32 %v829_v40, 0.0  ;;  %v844_v44 = vadd.f32 %v3171_v42, %v679_v15  ;;  %962 = vrot.lane.b32.xlu0 %v872_v39, %s3641_s23 }
 0x32c   :  { %v838_v45 = vpop.f32.mrf.mxu1 }
 0x32d   :  { %884 = vst.msk [vmem:[#allocation3 + $0x20] sm:$0xff] %vm879_vm5, %v871_v43  ;;  %v874_v46 = vmax.f32 %v844_v44, 0.0  ;;  %v839_v47 = vadd.f32 %v838_v45, %v674_v14  ;;  %960 = vrot.lane.b32.xlu1 %v871_v43, %s3641_s23 }
 0x32e   :  { %v3174_v49 = vpop.f32.mrf.mxu1  ;;  %v1035_v0 = vld [vmem:[#allocation3 + $0x18] sm:$0xff] }
 0x32f   :  { %887 = vst.msk [vmem:[#allocation3 + $0x38] sm:$0xff] %vm879_vm5, %v874_v46  ;;  %v873_v50 = vmax.f32 %v839_v47, 0.0  ;;  %v854_v51 = vadd.f32 %v3174_v49, %v689_v48  ;;  %966 = vrot.lane.b32.xlu0 %v874_v46, %s3641_s23 }
 0x330   :  { %v848_v53 = vpop.f32.mrf.mxu1 }
 0x331   :  { %886 = vst.msk [vmem:[#allocation3 + $0x30] sm:$0xff] %vm879_vm5, %v873_v50  ;;  %v876_v54 = vmax.f32 %v854_v51, 0.0  ;;  %v849_v55 = vadd.f32 %v848_v53, %v684_v52  ;;  %964 = vrot.lane.b32.xlu1 %v873_v50, %s3641_s23 }
 0x332   :  { %v3177_v56 = vpop.f32.mrf.mxu1 }
 0x333   :  { %889 = vst.msk [vmem:[#allocation3 + $0x48] sm:$0xff] %vm879_vm5, %v876_v54  ;;  %v875_v57 = vmax.f32 %v849_v55, 0.0  ;;  %v864_v58 = vadd.f32 %v3177_v56, %v699_v37  ;;  %906 = vrot.lane.b32.xlu0 %v868_v26, %s3642_s26  ;;  %v1037_v56 = vld [vmem:[#allocation3 + $0x28] sm:$0xff] }
 0x334   :  { %v858_v59 = vpop.f32.mrf.mxu1  ;;  %v1036_v51 = vld [vmem:[#allocation3 + $0x20] sm:$0xff] }
 0x335   :  { %888 = vst.msk [vmem:[#allocation3 + $0x40] sm:$0xff] %vm879_vm5, %v875_v57  ;;  %v878_v60 = vmax.f32 %v864_v58, 0.0  ;;  %v859_v61 = vadd.f32 %v858_v59, %v694_v41  ;;  %904 = vrot.lane.b32.xlu1 %v867_v29, %s3642_s26  ;;  %v1070_v58 = vpack.c.bf16 %v1037_v56, %v1036_v51  ;;  %v1034_v59 = vld [vmem:[#allocation3 + $0x10] sm:$0xff] }
 0x336   :  { %v1039_v48 = vld [vmem:[#allocation3 + $0x38] sm:$0xff] }
 0x337   :  { %891 = vst.msk [vmem:[#allocation3 + $0x58] sm:$0xff] %vm879_vm5, %v878_v60  ;;  %v877_v62 = vmax.f32 %v859_v61, 0.0  ;;  %958 = vrot.lane.b32.xlu0 %v870_v32, %s3641_s23 }
 0x339   :  { %890 = vst.msk [vmem:[#allocation3 + $0x50] sm:$0xff] %vm879_vm5, %v877_v62  ;;  %956 = vrot.lane.b32.xlu1 %v869_v35, %s3641_s23 }
 0x33a   :  { %v1041_v40 = vld [vmem:[#allocation3 + $0x48] sm:$0xff] }
 0x33b   :  { %954 = vrot.lane.b32.xlu0 %v868_v26, %s3641_s23 }
 0x33c   :  { %v1040_v35 = vld [vmem:[#allocation3 + $0x40] sm:$0xff] }
 0x33d   :  { %952 = vrot.lane.b32.xlu1 %v867_v29, %s3641_s23  ;;  %v1072_v42 = vpack.c.bf16 %v1041_v40, %v1040_v35  ;;  %v3303_v35 = vld [vmem:[#allocation14 + $0x94] ss:$12 sps:$4 sm:$0xff]  }
 0x33e   :  { %v1043_v32 = vld [vmem:[#allocation3 + $0x58] sm:$0xff] }
 0x33f   :  { %926 = vrot.lane.b32.xlu0 %v878_v60, %s3642_s26 }
 0x340   :  { %v1042_v27 = vld [vmem:[#allocation3 + $0x50] sm:$0xff] }
 0x341   :  { %924 = vrot.lane.b32.xlu1 %v877_v62, %s3642_s26  ;;  %v1073_v34 = vpack.c.bf16 %v1043_v32, %v1042_v27  ;;  %v3292_v27 = vld [vmem:[#allocation14 + $0x48] ss:$12 sps:$4 sm:$0xff]   ;;  %v3307_v32 = vld [vmem:[#allocation14 + $0xb0] ss:$12 sps:$4 sm:$0xff]  }
 0x343   :  { %922 = vrot.lane.b32.xlu0 %v876_v54, %s3642_s26 }
 0x345   :  { %920 = vrot.lane.b32.xlu1 %v875_v57, %s3642_s26 }
 0x347   :  { %918 = vrot.lane.b32.xlu0 %v874_v46, %s3642_s26 }
 0x349   :  { %916 = vrot.lane.b32.xlu1 %v873_v50, %s3642_s26 }
 0x34b   :  { %914 = vrot.lane.b32.xlu0 %v872_v39, %s3642_s26 }
 0x34d   :  { %912 = vrot.lane.b32.xlu1 %v871_v43, %s3642_s26  ;;  %v1038_v43 = vld [vmem:[#allocation3 + $0x30] sm:$0xff] }
 0x34e   :  { %v1071_v50 = vpack.c.bf16 %v1039_v48, %v1038_v43 }
 0x34f   :  { %974 = vrot.lane.b32.xlu0 %v878_v60, %s3641_s23 }
 0x351   :  { %972 = vrot.lane.b32.xlu1 %v877_v62, %s3641_s23 }
 0x353   :  { %970 = vrot.lane.b32.xlu0 %v876_v54, %s3641_s23 }
 0x355   :  { %968 = vrot.lane.b32.xlu1 %v875_v57, %s3641_s23 }
 0x399   :  { %v911_v1 = vpop.permute.xlu0 %910 }
 0x39a   :  { %943 = vst.msk [vmem:[#allocation3 + $0x78] sm:$0xff] %vm879_vm5, %v911_v1 }
 0x39b   :  { %v909_v2 = vpop.permute.xlu1 %908 }
 0x39c   :  { %942 = vst.msk [vmem:[#allocation3 + $0x70] sm:$0xff] %vm879_vm5, %v909_v2  ;;  %v1069_v2 = vpack.c.bf16 %v1035_v0, %v1034_v59 }
 0x39d   :  { %v963_v3 = vpop.permute.xlu0 %962 }
 0x39e   :  { %993 = vst.msk [vmem:[#allocation3 + $0xe8] sm:$0xff] %vm879_vm5, %v963_v3  ;;  %v1032_v3 = vld [vmem:[#allocation3] sm:$0xff] }
 0x39f   :  { %v961_v4 = vpop.permute.xlu1 %960 }
 0x3a0   :  { %992 = vst.msk [vmem:[#allocation3 + $0xe0] sm:$0xff] %vm879_vm5, %v961_v4 }
 0x3a1   :  { %v967_v5 = vpop.permute.xlu0 %966  ;;  %v1047_v16 = vld [vmem:[#allocation3 + $0x78] sm:$0xff] }
 0x3a2   :  { %995 = vst.msk [vmem:[#allocation3 + $0xf8] sm:$0xff] %vm879_vm5, %v967_v5 }
 0x3a3   :  { %v965_v6 = vpop.permute.xlu1 %964  ;;  %v1046_v10 = vld [vmem:[#allocation3 + $0x70] sm:$0xff] }
 0x3a4   :  { %994 = vst.msk [vmem:[#allocation3 + $0xf0] sm:$0xff] %vm879_vm5, %v965_v6  ;;  %v1075_v19 = vpack.c.bf16 %v1047_v16, %v1046_v10  ;;  %v3279_v10 = vld [vmem:[#allocation14] ss:$12 sps:$4 sm:$0xff]  }
 0x3a5   :  { %v907_v7 = vpop.permute.xlu0 %906  ;;  %v1061_v20 = vld [vmem:[#allocation3 + $0xe8] sm:$0xff] }
 0x3a6   :  { %941 = vst.msk [vmem:[#allocation3 + $0x68] sm:$0xff] %vm879_vm5, %v907_v7 }
 0x3a7   :  { %v905_v8 = vpop.permute.xlu1 %904  ;;  %v1060_v14 = vld [vmem:[#allocation3 + $0xe0] sm:$0xff] }
 0x3a8   :  { %940 = vst.msk [vmem:[#allocation3 + $0x60] sm:$0xff] %vm879_vm5, %v905_v8  ;;  %v1082_v21 = vpack.c.bf16 %v1061_v20, %v1060_v14  ;;  %v1033_v8 = vld [vmem:[#allocation3 + $0x8] sm:$0xff]  ;;  %v3289_v20 = vld [vmem:[#allocation14 + $0x20] ss:$12 sps:$4 sm:$0xff]  }
 0x3a9   :  { %v959_v9 = vpop.permute.xlu0 %958  ;;  %v1063_v13 = vld [vmem:[#allocation3 + $0xf8] sm:$0xff] }
 0x3aa   :  { %991 = vst.msk [vmem:[#allocation3 + $0xd8] sm:$0xff] %vm879_vm5, %v959_v9  ;;  %v1068_v9 = vpack.c.bf16 %v1033_v8, %v1032_v3  ;;  %v1472_v3 = vld [vmem:[#allocation16] sm:$0xff] }
 0x3ab   :  { %v957_v11 = vpop.permute.xlu1 %956  ;;  %v1062_v12 = vld [vmem:[#allocation3 + $0xf0] sm:$0xff] }
 0x3ac   :  { %990 = vst.msk [vmem:[#allocation3 + $0xd0] sm:$0xff] %vm879_vm5, %v957_v11  ;;  %v1083_v15 = vpack.c.bf16 %v1063_v13, %v1062_v12  ;;  %v3282_v13 = vld [vmem:[#allocation14 + $0x1c] ss:$12 sps:$4 sm:$0xff]  }
 0x3ad   :  { %v955_v17 = vpop.permute.xlu0 %954  ;;  %v1045_v24 = vld [vmem:[#allocation3 + $0x68] sm:$0xff] }
 0x3ae   :  { %989 = vst.msk [vmem:[#allocation3 + $0xc8] sm:$0xff] %vm879_vm5, %v955_v17  ;;  %2989 = vmatprep.subr.bf16.mxu1 %v1083_v15 }
 0x3af   :  { %2990 = vmatpush3.bf16.msra.mxu1 %v1075_v19  ;;  %v953_v22 = vpop.permute.xlu1 %952  ;;  %v1044_v23 = vld [vmem:[#allocation3 + $0x60] sm:$0xff]  ;;  %v3284_v19 = vld [vmem:[#allocation14 + $0x18] ss:$12 sps:$4 sm:$0xff]  }
 0x3b0   :  { %988 = vst.msk [vmem:[#allocation3 + $0xc0] sm:$0xff] %vm879_vm5, %v953_v22  ;;  %2991 = vmatprep.subr.bf16.mxu1 %v1082_v21  ;;  %v1074_v25 = vpack.c.bf16 %v1045_v24, %v1044_v23  ;;  %v3285_v21 = vld [vmem:[#allocation14 + $0x34] ss:$12 sps:$4 sm:$0xff]   ;;  %v3293_v22 = vld [vmem:[#allocation14 + $0x38] ss:$12 sps:$4 sm:$0xff]  }
 0x3b1   :  { %v927_v26 = vpop.permute.xlu0 %926  ;;  %v1059_v30 = vld [vmem:[#allocation3 + $0xd8] sm:$0xff]  ;;  %v3287_v23 = vld [vmem:[#allocation14 + $0x30] ss:$12 sps:$4 sm:$0xff]  }
 0x3b2   :  { %951 = vst.msk [vmem:[#allocation3 + $0xb8] sm:$0xff] %vm879_vm5, %v927_v26  ;;  %v3294_v24 = vld [vmem:[#allocation14 + $0x50] ss:$12 sps:$4 sm:$0xff]   ;;  %v3298_v26 = vld [vmem:[#allocation14 + $0x68] ss:$12 sps:$4 sm:$0xff]  }
 0x3b3   :  { %2992 = vmatpush3.bf16.msra.mxu1 %v1074_v25  ;;  %v925_v28 = vpop.permute.xlu1 %924  ;;  %v1058_v29 = vld [vmem:[#allocation3 + $0xd0] sm:$0xff]  ;;  %v3290_v25 = vld [vmem:[#allocation14 + $0x4c] ss:$12 sps:$4 sm:$0xff]  }
 0x3b4   :  { %950 = vst.msk [vmem:[#allocation3 + $0xb0] sm:$0xff] %vm879_vm5, %v925_v28  ;;  %v1081_v31 = vpack.c.bf16 %v1059_v30, %v1058_v29  ;;  %v3299_v28 = vld [vmem:[#allocation14 + $0x80] ss:$12 sps:$4 sm:$0xff]   ;;  %v3295_v29 = vld [vmem:[#allocation14 + $0x64] ss:$12 sps:$4 sm:$0xff]  }
 0x3b5   :  { %v923_v33 = vpop.permute.xlu0 %922  ;;  %v1057_v38 = vld [vmem:[#allocation3 + $0xc8] sm:$0xff] }
 0x3b6   :  { %949 = vst.msk [vmem:[#allocation3 + $0xa8] sm:$0xff] %vm879_vm5, %v923_v33  ;;  %2993 = vmatprep.subr.bf16.mxu1 %v1081_v31  ;;  %v3306_v30 = vld [vmem:[#allocation14 + $0x98] ss:$12 sps:$4 sm:$0xff]   ;;  %v3297_v31 = vld [vmem:[#allocation14 + $0x60] ss:$12 sps:$4 sm:$0xff]  }
 0x3b7   :  { %2994 = vmatpush3.bf16.msra.mxu1 %v1073_v34  ;;  %v921_v36 = vpop.permute.xlu1 %920  ;;  %v1056_v37 = vld [vmem:[#allocation3 + $0xc0] sm:$0xff]  ;;  %v3300_v33 = vld [vmem:[#allocation14 + $0x7c] ss:$12 sps:$4 sm:$0xff]   ;;  %v3302_v34 = vld [vmem:[#allocation14 + $0x78] ss:$12 sps:$4 sm:$0xff]  }
 0x3b8   :  { %948 = vst.msk [vmem:[#allocation3 + $0xa0] sm:$0xff] %vm879_vm5, %v921_v36  ;;  %v1080_v39 = vpack.c.bf16 %v1057_v38, %v1056_v37  ;;  %v3305_v36 = vld [vmem:[#allocation14 + $0x90] ss:$12 sps:$4 sm:$0xff]   ;;  %v3308_v37 = vld [vmem:[#allocation14 + $0xac] ss:$12 sps:$4 sm:$0xff]  }
 0x3b9   :  { %v919_v41 = vpop.permute.xlu0 %918  ;;  %v1055_v46 = vld [vmem:[#allocation3 + $0xb8] sm:$0xff] }
 0x3ba   :  { %947 = vst.msk [vmem:[#allocation3 + $0x98] sm:$0xff] %vm879_vm5, %v919_v41  ;;  %2995 = vmatprep.subr.bf16.mxu1 %v1080_v39  ;;  %v3310_v38 = vld [vmem:[#allocation14 + $0xa8] ss:$12 sps:$4 sm:$0xff]   ;;  %v1475_v39 = vld [vmem:[#allocation16 + $0x18] sm:$0x7f] }
 0x3bb   :  { %2996 = vmatpush3.bf16.msra.mxu1 %v1072_v42  ;;  %v917_v44 = vpop.permute.xlu1 %916  ;;  %v1054_v45 = vld [vmem:[#allocation3 + $0xb0] sm:$0xff] }
 0x3bc   :  { %946 = vst.msk [vmem:[#allocation3 + $0x90] sm:$0xff] %vm879_vm5, %v917_v44  ;;  %v1079_v47 = vpack.c.bf16 %v1055_v46, %v1054_v45 }
 0x3bd   :  { %v915_v49 = vpop.permute.xlu0 %914  ;;  %v1053_v54 = vld [vmem:[#allocation3 + $0xa8] sm:$0xff] }
 0x3be   :  { %945 = vst.msk [vmem:[#allocation3 + $0x88] sm:$0xff] %vm879_vm5, %v915_v49  ;;  %2997 = vmatprep.subr.bf16.mxu1 %v1079_v47 }
 0x3bf   :  { %2998 = vmatpush3.bf16.msra.mxu1 %v1071_v50  ;;  %v913_v52 = vpop.permute.xlu1 %912  ;;  %v1052_v53 = vld [vmem:[#allocation3 + $0xa0] sm:$0xff] }
 0x3c0   :  { %944 = vst.msk [vmem:[#allocation3 + $0x80] sm:$0xff] %vm879_vm5, %v913_v52  ;;  %v1078_v55 = vpack.c.bf16 %v1053_v54, %v1052_v53 }
 0x3c1   :  { %v975_v57 = vpop.permute.xlu0 %974  ;;  %v1051_v62 = vld [vmem:[#allocation3 + $0x98] sm:$0xff] }
 0x3c2   :  { %999 = vst.msk [vmem:[#allocation3 + $0x118] sm:$0xff] %vm879_vm5, %v975_v57  ;;  %2999 = vmatprep.subr.bf16.mxu1 %v1078_v55 }
 0x3c3   :  { %3000 = vmatpush3.bf16.msra.mxu1 %v1070_v58  ;;  %v973_v60 = vpop.permute.xlu1 %972  ;;  %v1050_v61 = vld [vmem:[#allocation3 + $0x90] sm:$0xff] }
 0x3c4   :  { %998 = vst.msk [vmem:[#allocation3 + $0x110] sm:$0xff] %vm879_vm5, %v973_v60  ;;  %v1077_v63 = vpack.c.bf16 %v1051_v62, %v1050_v61  ;;  %v1474_v62 = vld [vmem:[#allocation16 + $0x10] sm:$0xff] }
 0x3c5   :  { %v971_v1 = vpop.permute.xlu0 %970  ;;  %v1049_v6 = vld [vmem:[#allocation3 + $0x88] sm:$0xff] }
 0x3c6   :  { %997 = vst.msk [vmem:[#allocation3 + $0x108] sm:$0xff] %vm879_vm5, %v971_v1  ;;  %3001 = vmatprep.subr.bf16.mxu1 %v1077_v63  ;;  %v1473_v1 = vld [vmem:[#allocation16 + $0x8] sm:$0xff] }
 0x3c7   :  { %3002 = vmatpush3.bf16.msra.mxu1 %v1069_v2  ;;  %v969_v4 = vpop.permute.xlu1 %968  ;;  %v1048_v5 = vld [vmem:[#allocation3 + $0x80] sm:$0xff] }
 0x3c8   :  { %996 = vst.msk [vmem:[#allocation3 + $0x100] sm:$0xff] %vm879_vm5, %v969_v4  ;;  %v1076_v7 = vpack.c.bf16 %v1049_v6, %v1048_v5 }
 0x3c9   :  { %v1067_v12 = vld [vmem:[#allocation3 + $0x118] sm:$0xff] }
 0x3ca   :  { %3003 = vmatprep.subr.bf16.mxu1 %v1076_v7 }
 0x3cb   :  { %3004 = vmatpush3.bf16.msra.mxu1 %v1068_v9  ;;  %v1066_v11 = vld [vmem:[#allocation3 + $0x110] sm:$0xff] }
 0x3cc   :  { %v1085_v14 = vpack.c.bf16 %v1067_v12, %v1066_v11 }
 0x3cd   :  { %v1065_v16 = vld [vmem:[#allocation3 + $0x108] sm:$0xff] }
 0x3ce   :  { %1263 = vmatmul.mubr.bf16.vlgmr.msra.gmra.mxu1 %v3279_v10  ;;  %3178 = vmatprep.subr.bf16.mxu0 %v1085_v14 }
 0x3cf   :  { %3179 = vmatpush3.bf16.msra.mxu0 %v1085_v14  ;;  %v1064_v15 = vld [vmem:[#allocation3 + $0x100] sm:$0xff]  ;;  %1270 = vmatprep.mubr.bf16.mxu1 %v3282_v13 }
 0x3d0   :  { %v1084_v17 = vpack.c.bf16 %v1065_v16, %v1064_v15 }
 0x3d2   :  { %3180 = vmatprep.subr.bf16.mxu0 %v1084_v17 }
 0x3d3   :  { %3181 = vmatpush3.bf16.msra.mxu0 %v1084_v17 }
 0x3d4   :  { %3198 = vmatprep.subr.msk.mxu0 %vm1549_vm6, %v1475_v39 }
 0x3d6   :  { %1271 = vmatmul.mubr.bf16.gmra.mxu1 %v3284_v19  ;;  %3183 = vmatmul.mubr.msk.bf16.vlgmr.msra.gmra.mxu0 %vm879_vm5, %v3289_v20 }
 0x3d7   :  { %1278 = vmatprep.mubr.bf16.mxu1 %v3285_v21  ;;  %3186 = vmatprep.mubr.msk.bf16.mxu0 %vm879_vm5, %v3293_v22 }
 0x3d8   :  { %3199 = vmatpush3.msk.msra.mxu0 %vm1549_vm6, %v1475_v39 }
 0x3d9   :  { %3200 = vmatprep.subr.mxu0 %v1474_v62 }
 0x3da   :  { %3201 = vmatpush3.msra.mxu0 %v1474_v62 }
 0x3db   :  { %3202 = vmatprep.subr.mxu0 %v1473_v1 }
 0x3dc   :  { %3203 = vmatpush3.msra.mxu0 %v1473_v1 }
 0x3dd   :  { %3204 = vmatprep.subr.mxu0 %v1472_v3 }
 0x3de   :  { %1279 = vmatmul.mubr.bf16.gmra.mxu1 %v3287_v23  ;;  %3187 = vmatmul.mubr.msk.bf16.gmra.mxu0 %vm879_vm5, %v3294_v24 }
 0x3df   :  { %1286 = vmatprep.mubr.bf16.mxu1 %v3290_v25  ;;  %3190 = vmatprep.mubr.msk.bf16.mxu0 %vm879_vm5, %v3298_v26 }
 0x3e0   :  { %3205 = vmatpush3.msra.mxu0 %v1472_v3 }
 0x3e6   :  { %1287 = vmatmul.mubr.bf16.gmra.mxu1 %v3292_v27  ;;  %3191 = vmatmul.mubr.msk.bf16.gmra.mxu0 %vm879_vm5, %v3299_v28 }
 0x3e7   :  { %1294 = vmatprep.mubr.bf16.mxu1 %v3295_v29  ;;  %3194 = vmatprep.mubr.msk.bf16.mxu0 %vm879_vm5, %v3306_v30 }
 0x3ee   :  { %1295 = vmatmul.mubr.bf16.gmra.mxu1 %v3297_v31  ;;  %3195 = vmatmul.mubr.msk.bf16.gmra.mxu0 %vm879_vm5, %v3307_v32 }
 0x3ef   :  { %1302 = vmatprep.mubr.bf16.mxu1 %v3300_v33 }
 0x3f6   :  { %1303 = vmatmul.mubr.bf16.gmra.mxu1 %v3302_v34 }
 0x3f7   :  { %1310 = vmatprep.mubr.bf16.mxu1 %v3303_v35 }
 0x3fe   :  { %1311 = vmatmul.mubr.bf16.gmra.mxu1 %v3305_v36 }
 0x3ff   :  { %1318 = vmatprep.mubr.bf16.mxu1 %v3308_v37 }
 0x406   :  { %1319 = vmatmul.mubr.bf16.gmra.mxu1 %v3310_v38 }
 0x48e   :  { %v3005_v40 = vpop.f32.mrf.mxu1 }
 0x490   :  { %v3006_v41 = vpop.f32.mrf.mxu1 }
 0x491   :  { %v3007_v7 = vadd.f32 %v3006_v41, %v3005_v40 }
 0x492   :  { %v3008_v42 = vpop.f32.mrf.mxu1 }
 0x494   :  { %v3009_v43 = vpop.f32.mrf.mxu1 }
 0x495   :  { %v3010_v14 = vadd.f32 %v3009_v43, %v3008_v42 }
 0x496   :  { %v3011_v44 = vpop.f32.mrf.mxu1  ;;  %v3184_v45 = vpop.f32.mrf.mxu0 }
 0x498   :  { %v3012_v46 = vpop.f32.mrf.mxu1  ;;  %v1361_v47 = vpop.f32.mrf.mxu0 }
 0x499   :  { %v1362_v11 = vadd.f32 %v3007_v7, %v1361_v47  ;;  %v3013_v20 = vadd.f32 %v3012_v46, %v3011_v44  ;;  %v1476_v7 = vld [vmem:[#allocation17] sm:$0xff] }
 0x49a   :  { %v3014_v48 = vpop.f32.mrf.mxu1  ;;  %v3185_v49 = vpop.f32.mrf.mxu0 }
 0x49b   :  { %v1370_v29 = vadd.f32 %v3184_v45, %v3013_v20 }
 0x49c   :  { %v3015_v50 = vpop.f32.mrf.mxu1  ;;  %v1364_v51 = vpop.f32.mrf.mxu0 }
 0x49d   :  { %v1365_v21 = vadd.f32 %v3010_v14, %v1364_v51  ;;  %v3016_v28 = vadd.f32 %v3015_v50, %v3014_v48 }
 0x49e   :  { %v3017_v52 = vpop.f32.mrf.mxu1  ;;  %v4013_v53 = vpop.f32.mrf.mxu0 }
 0x49f   :  { %v1373_v37 = vadd.f32 %v3185_v49, %v3016_v28 }
 0x4a0   :  { %v3018_v54 = vpop.f32.mrf.mxu1  ;;  %v1377_v55 = vpop.f32.mrf.mxu0 }
 0x4a1   :  { %v3019_v36 = vadd.f32 %v3018_v54, %v3017_v52 }
 0x4a2   :  { %v3020_v56 = vpop.f32.mrf.mxu1  ;;  %v4015_v58 = vpop.f32.mrf.mxu0 }
 0x4a3   :  { %v1378_v45 = vadd.f32 %v3019_v36, %v1377_v55 }
 0x4a4   :  { %v3021_v57 = vpop.f32.mrf.mxu1  ;;  %v4021_v61 = vpop.f32.mrf.mxu0 }
 0x4a5   :  { %v3022_v44 = vadd.f32 %v3021_v57, %v3020_v56 }
 0x4a6   :  { %v4017_v59 = vpop.f32.mrf.mxu1  ;;  %v3192_v0 = vpop.f32.mrf.mxu0 }
 0x4a7   :  { %v1381_v54 = vadd.f32 %v3022_v44, %v4021_v61 }
 0x4a8   :  { %v4019_v60 = vpop.f32.mrf.mxu1  ;;  %v1393_v5 = vpop.f32.mrf.mxu0 }
 0x4a9   :  { %v3025_v49 = vadd.f32 %v4019_v60, %v4017_v59 }
 0x4aa   :  { %v4023_v63 = vpop.f32.mrf.mxu1  ;;  %v3193_v10 = vpop.f32.mrf.mxu0 }
 0x4ab   :  { %v1386_v57 = vadd.f32 %v4013_v53, %v3025_v49  ;;  %v1478_v53 = vld [vmem:[#allocation17 + $0x10] sm:$0xff] }
 0x4ac   :  { %v4025_v2 = vpop.f32.mrf.mxu1  ;;  %v1396_v19 = vpop.f32.mrf.mxu0 }
 0x4ad   :  { %v3028_v3 = vadd.f32 %v4025_v2, %v4023_v63  ;;  %v1482_v63 = vld [vmem:[#allocation17 + $0x30] sm:$0xff]  ;;  %v1477_v2 = vld [vmem:[#allocation17 + $0x8] sm:$0xff] }
 0x4ae   :  { %v3029_v4 = vpop.f32.mrf.mxu1  ;;  %v3196_v24 = vpop.f32.mrf.mxu0 }
 0x4af   :  { %v1389_v60 = vadd.f32 %v4015_v58, %v3028_v3  ;;  %v1483_v58 = vld [vmem:[#allocation17 + $0x38] sm:$0xff] }
 0x4b0   :  { %v3030_v6 = vpop.f32.mrf.mxu1  ;;  %v1409_v32 = vpop.f32.mrf.mxu0 }
 0x4b1   :  { %v3031_v8 = vadd.f32 %v3030_v6, %v3029_v4 }
 0x4b2   :  { %v3032_v9 = vpop.f32.mrf.mxu1  ;;  %v3197_v40 = vpop.f32.mrf.mxu0 }
 0x4b3   :  { %v1394_v12 = vadd.f32 %v3031_v8, %v1393_v5 }
 0x4b4   :  { %v3033_v13 = vpop.f32.mrf.mxu1  ;;  %v1412_v48 = vpop.f32.mrf.mxu0 }
 0x4b5   :  { %v4027_v15 = vmax.f32 %v1362_v11, %v1394_v12  ;;  %v3034_v16 = vadd.f32 %v3033_v13, %v3032_v9  ;;  %v1480_v9 = vld [vmem:[#allocation17 + $0x20] sm:$0xff]  ;;  %v1481_v11 = vld [vmem:[#allocation17 + $0x28] sm:$0xff] }
 0x4b6   :  { %v3035_v17 = vpop.f32.mrf.mxu1 }
 0x4b7   :  { %v1397_v22 = vadd.f32 %v3034_v16, %v1396_v19  ;;  %1440 = vrot.lane.b32.xlu1 %v4027_v15, %s3642_s26 }
 0x4b8   :  { %v3036_v23 = vpop.f32.mrf.mxu1 }
 0x4b9   :  { %v4031_v25 = vmax.f32 %v1365_v21, %v1397_v22  ;;  %v3037_v26 = vadd.f32 %v3036_v23, %v3035_v17 }
 0x4ba   :  { %v3038_v27 = vpop.f32.mrf.mxu1 }
 0x4bb   :  { %v1402_v30 = vadd.f32 %v3192_v0, %v3037_v26  ;;  %1442 = vrot.lane.b32.xlu0 %v4031_v25, %s3642_s26 }
 0x4bc   :  { %v3039_v31 = vpop.f32.mrf.mxu1 }
 0x4bd   :  { %v3040_v33 = vadd.f32 %v3039_v31, %v3038_v27  ;;  %v4035_v34 = vmax.f32 %v1370_v29, %v1402_v30  ;;  %v3644_v30 = vmov 1983009808  }
 0x4be   :  { %v3041_v35 = vpop.f32.mrf.mxu1  ;;  %v1670_v31 = vunpack.c.l.s4 %v3644_v30 }
 0x4bf   :  { %v1405_v38 = vadd.f32 %v3193_v10, %v3040_v33  ;;  %1444 = vrot.lane.b32.xlu1 %v4035_v34, %s3642_s26  ;;  %v1479_v10 = vld [vmem:[#allocation17 + $0x18] sm:$0xff] }
 0x4c0   :  { %v3042_v39 = vpop.f32.mrf.mxu1 }
 0x4c1   :  { %v3043_v41 = vadd.f32 %v3042_v39, %v3041_v35  ;;  %v1427_v42 = vmax.f32 %v1373_v37, %v1405_v38  ;;  %v1671_v35 = vunpack.c.0.s8 %v1670_v31 }
 0x4c2   :  { %v3044_v43 = vpop.f32.mrf.mxu1 }
 0x4c3   :  { %v1410_v46 = vadd.f32 %v3043_v41, %v1409_v32  ;;  %1446 = vrot.lane.b32.xlu0 %v1427_v42, %s3642_s26  ;;  %v1672_v32 = vlaneseq }
 0x4c4   :  { %v3045_v47 = vpop.f32.mrf.mxu1 }
 0x4c5   :  { %v1428_v50 = vmax.f32 %v1378_v45, %v1410_v46  ;;  %v3046_v51 = vadd.f32 %v3045_v47, %v3044_v43  ;;  %v4062_v36 = vshrl.u32 %v1672_v32, 7 }
 0x4c6   :  { %v3047_v52 = vpop.f32.mrf.mxu1 }
 0x4c7   :  { %v1413_v62 = vadd.f32 %v3046_v51, %v1412_v48  ;;  %1448 = vrot.lane.b32.xlu1 %v1428_v50, %s3642_s26 }
 0x4c8   :  { %v3048_v0 = vpop.f32.mrf.mxu1 }
 0x4c9   :  { %v1429_v1 = vmax.f32 %v1381_v54, %v1413_v62  ;;  %v3049_v56 = vadd.f32 %v3048_v0, %v3047_v52 }
 0x4ca   :  { %v3050_v55 = vpop.f32.mrf.mxu1 }
 0x4cb   :  { %v1418_v4 = vadd.f32 %v3196_v24, %v3049_v56  ;;  %1450 = vrot.lane.b32.xlu0 %v1429_v1, %s3642_s26 }
 0x4cc   :  { %v3051_v5 = vpop.f32.mrf.mxu1 }
 0x4cd   :  { %v3052_v6 = vadd.f32 %v3051_v5, %v3050_v55  ;;  %v1430_v59 = vmax.f32 %v1386_v57, %v1418_v4 }
 0x4cf   :  { %v1421_v61 = vadd.f32 %v3197_v40, %v3052_v6  ;;  %1452 = vrot.lane.b32.xlu1 %v1430_v59, %s3642_s26  ;;  %v4065_v40 = vsub.s32 %v1671_v35, %v4062_v36 }
 0x4d1   :  { %v1431_v8 = vmax.f32 %v1389_v60, %v1421_v61 }
 0x4d3   :  { %1454 = vrot.lane.b32.xlu0 %v1431_v8, %s3642_s26  ;;  %1486 = vperm.xlu1 %3266, %v1476_v7  }
 0x4d7   :  { %1496 = vperm.xlu0 %3265, %v1478_v53   ;;  %1506 = vperm.xlu1 %3266, %v1480_v9  }
 0x4db   :  { %1516 = vperm.xlu0 %3265, %v1482_v63   ;;  %1491 = vperm.xlu1 %3266, %v1477_v2  }
 0x4df   :  { %1501 = vperm.xlu0 %3265, %v1479_v10   ;;  %1511 = vperm.xlu1 %3266, %v1481_v11  }
 0x4e3   :  { %1521 = vperm.xlu0 %3265, %v1483_v58  }
 0x529   :  { %v1441_v12 = vpop.permute.xlu1 %1440 }
 0x52a   :  { %v1464_v13 = vmax.f32 %v4027_v15, %v1441_v12 }
 0x52c   :  { %3206 = vmatprep.mubr.msk.f32.mxu0 %vm1524_vm7, %v1464_v13 }
 0x52d   :  { %v1443_v14 = vpop.permute.xlu0 %1442 }
 0x52e   :  { %v1465_v16 = vmax.f32 %v4031_v25, %v1443_v14 }
 0x530   :  { %3207 = vmatmul.mubr.msk.f32.vlgmr.msra.gmra.mxu0 %vm1524_vm7, %v1465_v16 }
 0x531   :  { %v1445_v17 = vpop.permute.xlu1 %1444 }
 0x532   :  { %v1466_v19 = vmax.f32 %v4035_v34, %v1445_v17 }
 0x534   :  { %3209 = vmatprep.mubr.msk.f32.mxu0 %vm1524_vm7, %v1466_v19 }
 0x535   :  { %v1447_v20 = vpop.permute.xlu0 %1446 }
 0x536   :  { %v1467_v21 = vmax.f32 %v1427_v42, %v1447_v20 }
 0x538   :  { %3210 = vmatmul.mubr.msk.f32.gmra.mxu0 %vm1524_vm7, %v1467_v21 }
 0x539   :  { %v1449_v22 = vpop.permute.xlu1 %1448 }
 0x53a   :  { %v1468_v23 = vmax.f32 %v1428_v50, %v1449_v22 }
 0x53c   :  { %3212 = vmatprep.mubr.msk.f32.mxu0 %vm1524_vm7, %v1468_v23 }
 0x53d   :  { %v1451_v15 = vpop.permute.xlu0 %1450 }
 0x53e   :  { %v1469_v24 = vmax.f32 %v1429_v1, %v1451_v15 }
 0x540   :  { %3213 = vmatmul.mubr.msk.f32.gmra.mxu0 %vm1524_vm7, %v1469_v24 }
 0x541   :  { %v1453_v25 = vpop.permute.xlu1 %1452 }
 0x542   :  { %v1470_v26 = vmax.f32 %v1430_v59, %v1453_v25 }
 0x544   :  { %3215 = vmatprep.mubr.msk.f32.mxu0 %vm1524_vm7, %v1470_v26 }
 0x545   :  { %v1455_v27 = vpop.permute.xlu0 %1454 }
 0x546   :  { %v1471_v28 = vmax.f32 %v1431_v8, %v1455_v27 }
 0x548   :  { %3216 = vmatmul.mubr.msk.f32.gmra.mxu0 %vm1524_vm7, %v1471_v28 }
 0x54e   :  { %v1487_v29 = vpop.permute.xlu1 %1486 }
 0x552   :  { %v1507_v33 = vpop.permute.xlu1 %1506  ;;  %v1497_v34 = vpop.permute.xlu0 %1496 }
 0x556   :  { %v1492_v37 = vpop.permute.xlu1 %1491  ;;  %v1517_v41 = vpop.permute.xlu0 %1516 }
 0x55a   :  { %v1502_v47 = vpop.permute.xlu0 %1501  ;;  %v1512_v9 = vpop.permute.xlu1 %1511 }
 0x55e   :  { %v1522_v20 = vpop.permute.xlu0 %1521 }
 0x5f0   :  { %v3208_v38 = vpop.f32.mrf.mxu0 }
 0x5f1   :  { %v1625_v39 = vadd.f32 %v3208_v38, %v1492_v37 }
 0x5f2   :  { %v1619_v42 = vpop.f32.mrf.mxu0 }
 0x5f3   :  { %v1659_v43 = vmax.f32 %v1625_v39, 0.0  ;;  %v1620_v44 = vadd.f32 %v1619_v42, %v1487_v29 }
 0x5f5   :  { %v1658_v45 = vmax.f32 %v1620_v44, 0.0  ;;  %v1708_v46 = vrot.slane %v1659_v43, %v4065_v40  ;;  %v1720_v50 = vcombine.high %v1659_v43, %v1659_v43 }
 0x5f7   :  { %1709 = vrot.lane.b32.xlu1 %v1708_v46, %s3634_s30  ;;  %1667 = vst.msk [vmem:[#allocation4] sm:$0x3] %vm1666_vm8, %v1658_v45  ;;  %v1714_v51 = vcombine.high %v1708_v46, %v1708_v46  ;;  %v1727_v56 = vrot.slane %v1720_v50, %v4065_v40  ;;  %v1675_v55 = vrot.slane %v1658_v45, %v4065_v40 }
 0x5f8   :  { %v3211_v48 = vpop.f32.mrf.mxu0  ;;  %v1682_v3 = vcombine.high %v1658_v45, %v1658_v45 }
 0x5f9   :  { %v1635_v52 = vadd.f32 %v3211_v48, %v1502_v47  ;;  %v1676_v6 = vcombine.high %v1675_v55, %v1675_v55  ;;  %v1733_v58 = vcombine.high %v1727_v56, %v1727_v56 }
 0x5fa   :  { %v1629_v49 = vpop.f32.mrf.mxu0  ;;  %v1689_v8 = vrot.slane %v1682_v3, %v4065_v40 }
 0x5fb   :  { %v1661_v54 = vmax.f32 %v1635_v52, 0.0  ;;  %v1630_v62 = vadd.f32 %v1629_v49, %v1497_v34  ;;  %1715 = vrot.lane.b32.xlu1 %v1714_v51, %s3645_s0 }
 0x5fc   :  { %v1695_v19 = vcombine.high %v1689_v8, %v1689_v8 }
 0x5fd   :  { %v1660_v0 = vmax.f32 %v1630_v62, 0.0  ;;  %v1777_v1 = vrot.slane %v1661_v54, %v4065_v40  ;;  %v1787_v4 = vcombine.high %v1661_v54, %v1661_v54 }
 0x5ff   :  { %1778 = vrot.lane.b32.xlu0 %v1777_v1, %s3634_s30  ;;  %1728 = vrot.lane.b32.xlu1 %v1727_v56, %s3646_s3  ;;  %1739 = vst.msk [vmem:[#allocation4 + $0x2] sm:$0x3] %vm1666_vm8, %v1660_v0  ;;  %v1782_v5 = vcombine.high %v1777_v1, %v1777_v1  ;;  %v1794_v7 = vrot.slane %v1787_v4, %v4065_v40 }
 0x600   :  { %v3214_v57 = vpop.f32.mrf.mxu0  ;;  %v1747_v53 = vrot.slane %v1660_v0, %v4065_v40  ;;  %v1753_v2 = vcombine.high %v1660_v0, %v1660_v0 }
 0x601   :  { %v1645_v10 = vadd.f32 %v3214_v57, %v1512_v9  ;;  %v1799_v22 = vcombine.high %v1794_v7, %v1794_v7 }
 0x602   :  { %v1639_v59 = vpop.f32.mrf.mxu0  ;;  %v1748_v11 = vcombine.high %v1747_v53, %v1747_v53  ;;  %v1760_v17 = vrot.slane %v1753_v2, %v4065_v40 }
 0x603   :  { %v1640_v60 = vadd.f32 %v1639_v59, %v1507_v33  ;;  %1783 = vrot.lane.b32.xlu0 %v1782_v5, %s3645_s0  ;;  %1677 = vrot.lane.b32.xlu1 %v1676_v6, %s3647_s27  ;;  %v1663_v14 = vmax.f32 %v1645_v10, 0.0 }
 0x604   :  { %v1765_v26 = vcombine.high %v1760_v17, %v1760_v17 }
 0x605   :  { %v1662_v61 = vmax.f32 %v1640_v60, 0.0  ;;  %v1842_v23 = vrot.slane %v1663_v14, %v4065_v40  ;;  %v1852_v15 = vcombine.high %v1663_v14, %v1663_v14 }
 0x607   :  { %1795 = vrot.lane.b32.xlu0 %v1794_v7, %s3646_s3  ;;  %1690 = vrot.lane.b32.xlu1 %v1689_v8, %s3648_s5  ;;  %1804 = vst.msk [vmem:[#allocation4 + $0x4] sm:$0x3] %vm1666_vm8, %v1662_v61  ;;  %v1847_v25 = vcombine.high %v1842_v23, %v1842_v23  ;;  %v1859_v28 = vrot.slane %v1852_v15, %v4065_v40 }
 0x608   :  { %v3217_v63 = vpop.f32.mrf.mxu0  ;;  %v1812_v29 = vrot.slane %v1662_v61, %v4065_v40  ;;  %v1818_v30 = vcombine.high %v1662_v61, %v1662_v61 }
 0x609   :  { %v1655_v21 = vadd.f32 %v3217_v63, %v1522_v20  ;;  %v1864_v42 = vcombine.high %v1859_v28, %v1859_v28 }
 0x60a   :  { %v1649_v12 = vpop.f32.mrf.mxu0  ;;  %v1813_v33 = vcombine.high %v1812_v29, %v1812_v29  ;;  %v1825_v35 = vrot.slane %v1818_v30, %v4065_v40 }
 0x60b   :  { %v1650_v13 = vadd.f32 %v1649_v12, %v1517_v41  ;;  %1749 = vrot.lane.b32.xlu0 %v1748_v11, %s3647_s27  ;;  %1734 = vrot.lane.b32.xlu1 %v1733_v58, %s3649_s28  ;;  %v1665_v24 = vmax.f32 %v1655_v21, 0.0 }
 0x60c   :  { %v1830_v41 = vcombine.high %v1825_v35, %v1825_v35 }
 0x60d   :  { %v1664_v16 = vmax.f32 %v1650_v13, 0.0  ;;  %v1907_v27 = vrot.slane %v1665_v24, %v4065_v40  ;;  %v1917_v31 = vcombine.high %v1665_v24, %v1665_v24 }
 0x60f   :  { %1761 = vrot.lane.b32.xlu0 %v1760_v17, %s3648_s5  ;;  %1696 = vrot.lane.b32.xlu1 %v1695_v19, %s3650_s29  ;;  %1869 = vst.msk [vmem:[#allocation4 + $0x6] sm:$0x3] %vm1666_vm8, %v1664_v16  ;;  %v1912_v32 = vcombine.high %v1907_v27, %v1907_v27  ;;  %v1924_v34 = vrot.slane %v1917_v31, %v4065_v40 }
 0x610   :  { %v1877_v37 = vrot.slane %v1664_v16, %v4065_v40  ;;  %v1883_v38 = vcombine.high %v1664_v16, %v1664_v16 }
 0x611   :  { %v1929_v45 = vcombine.high %v1924_v34, %v1924_v34 }
 0x612   :  { %v1878_v39 = vcombine.high %v1877_v37, %v1877_v37  ;;  %v1890_v43 = vrot.slane %v1883_v38, %v4065_v40 }
 0x613   :  { %1800 = vrot.lane.b32.xlu0 %v1799_v22, %s3649_s28  ;;  %1843 = vrot.lane.b32.xlu1 %v1842_v23, %s3634_s30 }
 0x614   :  { %v1895_v44 = vcombine.high %v1890_v43, %v1890_v43 }
 0x617   :  { %1766 = vrot.lane.b32.xlu0 %v1765_v26, %s3650_s29  ;;  %1848 = vrot.lane.b32.xlu1 %v1847_v25, %s3645_s0 }
 0x61b   :  { %1908 = vrot.lane.b32.xlu0 %v1907_v27, %s3634_s30  ;;  %1860 = vrot.lane.b32.xlu1 %v1859_v28, %s3646_s3 }
 0x61f   :  { %1913 = vrot.lane.b32.xlu0 %v1912_v32, %s3645_s0  ;;  %1814 = vrot.lane.b32.xlu1 %v1813_v33, %s3647_s27 }
 0x623   :  { %1925 = vrot.lane.b32.xlu0 %v1924_v34, %s3646_s3  ;;  %1826 = vrot.lane.b32.xlu1 %v1825_v35, %s3648_s5 }
 0x627   :  { %1879 = vrot.lane.b32.xlu0 %v1878_v39, %s3647_s27  ;;  %1831 = vrot.lane.b32.xlu1 %v1830_v41, %s3650_s29 }
 0x62b   :  { %1891 = vrot.lane.b32.xlu0 %v1890_v43, %s3648_s5  ;;  %1865 = vrot.lane.b32.xlu1 %v1864_v42, %s3649_s28 }
 0x62f   :  { %1896 = vrot.lane.b32.xlu0 %v1895_v44, %s3650_s29 }
 0x633   :  { %1930 = vrot.lane.b32.xlu0 %v1929_v45, %s3649_s28 }
 0x669   :  { %v1710_v46 = vpop.permute.xlu1 %1709 }
 0x66d   :  { %v1716_v47 = vpop.permute.xlu1 %1715 }
 0x671   :  { %v1779_v48 = vpop.permute.xlu0 %1778  ;;  %v1729_v50 = vpop.permute.xlu1 %1728 }
 0x675   :  { %v1784_v51 = vpop.permute.xlu0 %1783  ;;  %v1678_v52 = vpop.permute.xlu1 %1677 }
 0x676   :  { %1681 = vst.msk [vmem:[#allocation4] sm:$0x3] %vm1680_vm9, %v1678_v52 }
 0x679   :  { %v1796_v49 = vpop.permute.xlu0 %1795  ;;  %v1691_v54 = vpop.permute.xlu1 %1690 }
 0x67a   :  { %1694 = vst.msk [vmem:[#allocation4] sm:$0x3] %vm1693_vm10, %v1691_v54 }
 0x67d   :  { %v1750_v62 = vpop.permute.xlu0 %1749  ;;  %v1735_v0 = vpop.permute.xlu1 %1734 }
 0x67e   :  { %1752 = vst.msk [vmem:[#allocation4 + $0x2] sm:$0x3] %vm1680_vm9, %v1750_v62 }
 0x681   :  { %v1762_v1 = vpop.permute.xlu0 %1761  ;;  %v1697_v56 = vpop.permute.xlu1 %1696 }
 0x682   :  { %1764 = vst.msk [vmem:[#allocation4 + $0x2] sm:$0x3] %vm1693_vm10, %v1762_v1 }
 0x683   :  { %1700 = vst.msk [vmem:[#allocation4] sm:$0x3] %vm1699_vm11, %v1697_v56 }
 0x684   :  { %1713 = vst.msk [vmem:[#allocation4] sm:$0x3] %vm1712_vm12, %v1710_v46 }
 0x685   :  { %1719 = vst.msk [vmem:[#allocation4] sm:$0x3] %vm1718_vm13, %v1716_v47  ;;  %v1801_v55 = vpop.permute.xlu0 %1800  ;;  %v1844_v57 = vpop.permute.xlu1 %1843 }
 0x686   :  { %1732 = vst.msk [vmem:[#allocation4] sm:$0x3] %vm1731_vm14, %v1729_v50 }
 0x687   :  { %1738 = vst.msk [vmem:[#allocation4] sm:$0x3] %vm1737_vm15, %v1735_v0 }
 0x689   :  { %v1767_v3 = vpop.permute.xlu0 %1766  ;;  %v1849_v4 = vpop.permute.xlu1 %1848 }
 0x68a   :  { %1769 = vst.msk [vmem:[#allocation4 + $0x2] sm:$0x3] %vm1699_vm11, %v1767_v3 }
 0x68b   :  { %1781 = vst.msk [vmem:[#allocation4 + $0x2] sm:$0x3] %vm1712_vm12, %v1779_v48 }
 0x68c   :  { %1786 = vst.msk [vmem:[#allocation4 + $0x2] sm:$0x3] %vm1718_vm13, %v1784_v51 }
 0x68d   :  { %v1909_v5 = vpop.permute.xlu0 %1908  ;;  %v1861_v6 = vpop.permute.xlu1 %1860  ;;  %1798 = vst.msk [vmem:[#allocation4 + $0x2] sm:$0x3] %vm1731_vm14, %v1796_v49 }
 0x68e   :  { %1803 = vst.msk [vmem:[#allocation4 + $0x2] sm:$0x3] %vm1737_vm15, %v1801_v55 }
 0x691   :  { %v1914_v59 = vpop.permute.xlu0 %1913  ;;  %v1815_v60 = vpop.permute.xlu1 %1814 }
 0x692   :  { %1817 = vst.msk [vmem:[#allocation4 + $0x4] sm:$0x3] %vm1680_vm9, %v1815_v60 }
 0x695   :  { %v1926_v61 = vpop.permute.xlu0 %1925  ;;  %v1827_v7 = vpop.permute.xlu1 %1826 }
 0x696   :  { %1829 = vst.msk [vmem:[#allocation4 + $0x4] sm:$0x3] %vm1693_vm10, %v1827_v7 }
 0x699   :  { %v1880_v8 = vpop.permute.xlu0 %1879  ;;  %v1832_v53 = vpop.permute.xlu1 %1831 }
 0x69a   :  { %1882 = vst.msk [vmem:[#allocation4 + $0x6] sm:$0x3] %vm1680_vm9, %v1880_v8 }
 0x69b   :  { %1834 = vst.msk [vmem:[#allocation4 + $0x4] sm:$0x3] %vm1699_vm11, %v1832_v53 }
 0x69c   :  { %1846 = vst.msk [vmem:[#allocation4 + $0x4] sm:$0x3] %vm1712_vm12, %v1844_v57 }
 0x69d   :  { %1851 = vst.msk [vmem:[#allocation4 + $0x4] sm:$0x3] %vm1718_vm13, %v1849_v4  ;;  %v1892_v9 = vpop.permute.xlu0 %1891  ;;  %v1866_v63 = vpop.permute.xlu1 %1865 }
 0x69e   :  { %1863 = vst.msk [vmem:[#allocation4 + $0x4] sm:$0x3] %vm1731_vm14, %v1861_v6 }
 0x69f   :  { %1894 = vst.msk [vmem:[#allocation4 + $0x6] sm:$0x3] %vm1693_vm10, %v1892_v9 }
 0x6a0   :  { %1868 = vst.msk [vmem:[#allocation4 + $0x4] sm:$0x3] %vm1737_vm15, %v1866_v63 }
 0x6a1   :  { %v1897_v2 = vpop.permute.xlu0 %1896 }
 0x6a2   :  { %1899 = vst.msk [vmem:[#allocation4 + $0x6] sm:$0x3] %vm1699_vm11, %v1897_v2 }
 0x6a3   :  { %1911 = vst.msk [vmem:[#allocation4 + $0x6] sm:$0x3] %vm1712_vm12, %v1909_v5 }
 0x6a4   :  { %1916 = vst.msk [vmem:[#allocation4 + $0x6] sm:$0x3] %vm1718_vm13, %v1914_v59 }
 0x6a5   :  { %v1931_v10 = vpop.permute.xlu0 %1930  ;;  %1928 = vst.msk [vmem:[#allocation4 + $0x6] sm:$0x3] %vm1731_vm14, %v1926_v61 }
 0x6a6   :  { %1933 = vst.msk [vmem:[#allocation4 + $0x6] sm:$0x3] %vm1737_vm15, %v1931_v10 }
 0x6a7   :  { %3620 = dma.done.wait [#allocation7], 8192 }
 0x6a8   :  { %3621 = vsyncadd [#allocation7], 4294959104  ;;  %v3311_v11 = vld [vmem:[#allocation5 + $0x74] ss:$8 sps:$4 sm:$0xff]   ;;  %v3315_v12 = vld [vmem:[#allocation5 + $0x70] ss:$8 sps:$4 sm:$0xff]  }
 0x6a9   :  { %v3313_v58 = vld [vmem:[#allocation5 + $0x174] ss:$8 sps:$4 sm:$0xff]   ;;  %2361 = vmatprep.subr.bf16.mxu1 %v3311_v11  ;;  %v3316_v13 = vld [vmem:[#allocation5 + $0x170] ss:$8 sps:$4 sm:$0xff]   ;;  %v3317_v14 = vld [vmem:[#allocation5 + $0x64] ss:$8 sps:$4 sm:$0xff]  }
 0x6aa   :  { %2402 = vmatprep.subr.bf16.mxu0 %v3313_v58  ;;  %2362 = vmatpush1.bf16.msra.mxu1 %v3315_v12  ;;  %v3319_v16 = vld [vmem:[#allocation5 + $0x164] ss:$8 sps:$4 sm:$0xff]   ;;  %v3321_v17 = vld [vmem:[#allocation5 + $0x60] ss:$8 sps:$4 sm:$0xff]   ;;  %v3323_v20 = vld [vmem:[#allocation5 + $0x54] ss:$8 sps:$4 sm:$0xff]  }
 0x6ab   :  { %2403 = vmatpush1.bf16.msra.mxu0 %v3316_v13  ;;  %2363 = vmatprep.subr.bf16.mxu1 %v3317_v14  ;;  %v3322_v19 = vld [vmem:[#allocation5 + $0x160] ss:$8 sps:$4 sm:$0xff]   ;;  %v3325_v21 = vld [vmem:[#allocation5 + $0x154] ss:$8 sps:$4 sm:$0xff]   ;;  %v3327_v22 = vld [vmem:[#allocation5 + $0x50] ss:$8 sps:$4 sm:$0xff]  }
 0x6ac   :  { %2404 = vmatprep.subr.bf16.mxu0 %v3319_v16  ;;  %v3328_v23 = vld [vmem:[#allocation5 + $0x150] ss:$8 sps:$4 sm:$0xff]   ;;  %v3329_v15 = vld [vmem:[#allocation5 + $0x44] ss:$8 sps:$4 sm:$0xff]   ;;  %v3333_v25 = vld [vmem:[#allocation5 + $0x40] ss:$8 sps:$4 sm:$0xff]  }
 0x6ad   :  { %v3331_v24 = vld [vmem:[#allocation5 + $0x144] ss:$8 sps:$4 sm:$0xff]   ;;  %v3334_v26 = vld [vmem:[#allocation5 + $0x140] ss:$8 sps:$4 sm:$0xff]   ;;  %v3335_v27 = vld [vmem:[#allocation5 + $0x34] ss:$8 sps:$4 sm:$0xff]  }
 0x6ae   :  { %2364 = vmatpush1.bf16.msra.mxu1 %v3321_v17  ;;  %v3337_v28 = vld [vmem:[#allocation5 + $0x134] ss:$8 sps:$4 sm:$0xff]   ;;  %v3339_v29 = vld [vmem:[#allocation5 + $0x30] ss:$8 sps:$4 sm:$0xff]   ;;  %v3341_v31 = vld [vmem:[#allocation5 + $0x24] ss:$8 sps:$4 sm:$0xff]  }
 0x6af   :  { %2405 = vmatpush1.bf16.msra.mxu0 %v3322_v19  ;;  %2365 = vmatprep.subr.bf16.mxu1 %v3323_v20  ;;  %v3340_v30 = vld [vmem:[#allocation5 + $0x130] ss:$8 sps:$4 sm:$0xff]   ;;  %v3343_v32 = vld [vmem:[#allocation5 + $0x124] ss:$8 sps:$4 sm:$0xff]   ;;  %v3345_v33 = vld [vmem:[#allocation5 + $0x20] ss:$8 sps:$4 sm:$0xff]  }
 0x6b0   :  { %2406 = vmatprep.subr.bf16.mxu0 %v3325_v21  ;;  %v3346_v34 = vld [vmem:[#allocation5 + $0x120] ss:$8 sps:$4 sm:$0xff]   ;;  %v3347_v35 = vld [vmem:[#allocation5 + $0x14] ss:$8 sps:$4 sm:$0xff]   ;;  %v3351_v38 = vld [vmem:[#allocation5 + $0x10] ss:$8 sps:$4 sm:$0xff]  }
 0x6b1   :  { %v3349_v37 = vld [vmem:[#allocation5 + $0x114] ss:$8 sps:$4 sm:$0xff]   ;;  %v3352_v39 = vld [vmem:[#allocation5 + $0x110] ss:$8 sps:$4 sm:$0xff]   ;;  %v3353_v41 = vld [vmem:[#allocation5 + $0x4] ss:$8 sps:$4 sm:$0xff]  }
 0x6b2   :  { %2366 = vmatpush1.bf16.msra.mxu1 %v3327_v22  ;;  %v3355_v42 = vld [vmem:[#allocation5 + $0x104] ss:$8 sps:$4 sm:$0xff]   ;;  %v3357_v43 = vld [vmem:[#allocation5] ss:$8 sps:$4 sm:$0xff]   ;;  %v3359_v45 = vld [vmem:[#allocation5 + $0xf4] ss:$8 sps:$4 sm:$0xff]  }
 0x6b3   :  { %2407 = vmatpush1.bf16.msra.mxu0 %v3328_v23  ;;  %2367 = vmatprep.subr.bf16.mxu1 %v3329_v15  ;;  %v3358_v44 = vld [vmem:[#allocation5 + $0x100] ss:$8 sps:$4 sm:$0xff]   ;;  %v3361_v46 = vld [vmem:[#allocation5 + $0x1f4] ss:$8 sps:$4 sm:$0xff]   ;;  %v3363_v47 = vld [vmem:[#allocation5 + $0xf0] ss:$8 sps:$4 sm:$0xff]  }
 0x6b4   :  { %2408 = vmatprep.subr.bf16.mxu0 %v3331_v24  ;;  %v3364_v48 = vld [vmem:[#allocation5 + $0x1f0] ss:$8 sps:$4 sm:$0xff]   ;;  %v3365_v50 = vld [vmem:[#allocation5 + $0xe4] ss:$8 sps:$4 sm:$0xff]   ;;  %v3369_v52 = vld [vmem:[#allocation5 + $0xe0] ss:$8 sps:$4 sm:$0xff]  }
 0x6b5   :  { %v3367_v51 = vld [vmem:[#allocation5 + $0x1e4] ss:$8 sps:$4 sm:$0xff]   ;;  %v3370_v49 = vld [vmem:[#allocation5 + $0x1e0] ss:$8 sps:$4 sm:$0xff]   ;;  %v3371_v54 = vld [vmem:[#allocation5 + $0xd4] ss:$8 sps:$4 sm:$0xff]  }
 0x6b6   :  { %2368 = vmatpush1.bf16.msra.mxu1 %v3333_v25  ;;  %v3373_v62 = vld [vmem:[#allocation5 + $0x1d4] ss:$8 sps:$4 sm:$0xff]   ;;  %v3375_v0 = vld [vmem:[#allocation5 + $0xd0] ss:$8 sps:$4 sm:$0xff]   ;;  %v3377_v56 = vld [vmem:[#allocation5 + $0xc4] ss:$8 sps:$4 sm:$0xff]  }
 0x6b7   :  { %2409 = vmatpush1.bf16.msra.mxu0 %v3334_v26  ;;  %2369 = vmatprep.subr.bf16.mxu1 %v3335_v27  ;;  %v3376_v1 = vld [vmem:[#allocation5 + $0x1d0] ss:$8 sps:$4 sm:$0xff]   ;;  %v3379_v55 = vld [vmem:[#allocation5 + $0x1c4] ss:$8 sps:$4 sm:$0xff]   ;;  %v3381_v5 = vld [vmem:[#allocation5 + $0xc0] ss:$8 sps:$4 sm:$0xff]  }
 0x6b8   :  { %2410 = vmatprep.subr.bf16.mxu0 %v3337_v28  ;;  %v1938_v57 = vld [vmem:[#allocation4] sm:$0xff]  ;;  %v3382_v6 = vld [vmem:[#allocation5 + $0x1c0] ss:$8 sps:$4 sm:$0xff]   ;;  %v3389_v2 = vld [vmem:[#allocation5 + $0xa4] ss:$8 sps:$4 sm:$0xff]   ;;  %v2033_v15 = vsub.s32 0, %v4062_v36 }
 0x6b9   :  { %v1947_v3 = vrot.slane %v1938_v57, %v4065_v40  ;;  %v1940_v4 = vcombine.high %v1938_v57, %v1938_v57  ;;  %v3383_v59 = vld [vmem:[#allocation5 + $0xb4] ss:$8 sps:$4 sm:$0xff]   ;;  %v3387_v9 = vld [vmem:[#allocation5 + $0xb0] ss:$8 sps:$4 sm:$0xff]   ;;  %v3391_v10 = vld [vmem:[#allocation5 + $0x1a4] ss:$8 sps:$4 sm:$0xff]  }
 0x6ba   :  { %2370 = vmatpush1.bf16.msra.mxu1 %v3339_v29  ;;  %v3385_v60 = vld [vmem:[#allocation5 + $0x1b4] ss:$8 sps:$4 sm:$0xff]   ;;  %v3388_v63 = vld [vmem:[#allocation5 + $0x1b0] ss:$8 sps:$4 sm:$0xff]   ;;  %v3393_v58 = vld [vmem:[#allocation5 + $0xa0] ss:$8 sps:$4 sm:$0xff]  }
 0x6bb   :  { %2411 = vmatpush1.bf16.msra.mxu0 %v3340_v30  ;;  %2371 = vmatprep.subr.bf16.mxu1 %v3341_v31  ;;  %v1955_v61 = vcombine.high %v1947_v3, %v1947_v3  ;;  %v1954_v7 = vrot.slane %v1940_v4, %v4065_v40  ;;  %v3394_v12 = vld [vmem:[#allocation5 + $0x1a0] ss:$8 sps:$4 sm:$0xff]   ;;  %v3395_v40 = vld [vmem:[#allocation5 + $0x94] ss:$8 sps:$4 sm:$0xff]   ;;  %v3399_v14 = vld [vmem:[#allocation5 + $0x90] ss:$8 sps:$4 sm:$0xff]   ;;  %v1961_v22 = vpack.c.bf16 %v1947_v3, %v1947_v3 }
 0x6bc   :  { %2412 = vmatprep.subr.bf16.mxu0 %v3343_v32  ;;  %v3397_v13 = vld [vmem:[#allocation5 + $0x194] ss:$8 sps:$4 sm:$0xff]   ;;  %v3400_v16 = vld [vmem:[#allocation5 + $0x190] ss:$8 sps:$4 sm:$0xff]   ;;  %v3401_v17 = vld [vmem:[#allocation5 + $0x84] ss:$8 sps:$4 sm:$0xff]  }
 0x6bd   :  { %v1962_v8 = vpack.c.bf16 %v1955_v61, %v1955_v61  ;;  %v1956_v53 = vcombine.high %v1954_v7, %v1954_v7  ;;  %v3403_v19 = vld [vmem:[#allocation5 + $0x184] ss:$8 sps:$4 sm:$0xff]   ;;  %v3405_v20 = vld [vmem:[#allocation5 + $0x80] ss:$8 sps:$4 sm:$0xff]   ;;  %v1963_v23 = vpack.c.bf16 %v1954_v7, %v1954_v7  ;;  %v2029_v24 = vld [vmem:[%s4176_s8] sm:$0x3] }
 0x6be   :  { %2372 = vmatpush1.bf16.msra.mxu1 %v3345_v33  ;;  %v3406_v21 = vld [vmem:[#allocation5 + $0x180] ss:$8 sps:$4 sm:$0xff]   ;;  %v2037_v25 = vsub.s32 1, %v4062_v36  ;;  %v2034_v26 = vrot.slane %v2029_v24, %v2033_v15 }
 0x6bf   :  { %2413 = vmatpush1.bf16.msra.mxu0 %v3346_v34  ;;  %2373 = vmatprep.subr.bf16.mxu1 %v3347_v35  ;;  %v1964_v11 = vpack.c.bf16 %v1956_v53, %v1956_v53 }
 0x6c0   :  { %2414 = vmatprep.subr.bf16.mxu0 %v3349_v37  ;;  %2393 = vmatprep.mubr.bf16.mxu1 %v1962_v8  ;;  %v2038_v27 = vrot.slane %v2029_v24, %v2037_v25 }
 0x6c1   :  { %2434 = vmatprep.mubr.bf16.mxu0 %v1964_v11 }
 0x6c2   :  { %2374 = vmatpush1.bf16.msra.mxu1 %v3351_v38 }
 0x6c3   :  { %2415 = vmatpush1.bf16.msra.mxu0 %v3352_v39  ;;  %2375 = vmatprep.subr.bf16.mxu1 %v3353_v41 }
 0x6c4   :  { %2416 = vmatprep.subr.bf16.mxu0 %v3355_v42 }
 0x6c6   :  { %2376 = vmatpush1.bf16.msra.mxu1 %v3357_v43 }
 0x6c7   :  { %2417 = vmatpush1.bf16.msra.mxu0 %v3358_v44  ;;  %2377 = vmatprep.subr.bf16.mxu1 %v3359_v45 }
 0x6c8   :  { %2418 = vmatprep.subr.bf16.mxu0 %v3361_v46 }
 0x6ca   :  { %2378 = vmatpush2.bf16.msra.mxu1 %v3363_v47 }
 0x6cb   :  { %2419 = vmatpush2.bf16.msra.mxu0 %v3364_v48  ;;  %2379 = vmatprep.subr.bf16.mxu1 %v3365_v50 }
 0x6cc   :  { %2420 = vmatprep.subr.bf16.mxu0 %v3367_v51 }
 0x6ce   :  { %2380 = vmatpush2.bf16.msra.mxu1 %v3369_v52 }
 0x6cf   :  { %2421 = vmatpush2.bf16.msra.mxu0 %v3370_v49  ;;  %2381 = vmatprep.subr.bf16.mxu1 %v3371_v54 }
 0x6d0   :  { %2422 = vmatprep.subr.bf16.mxu0 %v3373_v62 }
 0x6d2   :  { %2382 = vmatpush2.bf16.msra.mxu1 %v3375_v0 }
 0x6d3   :  { %2423 = vmatpush2.bf16.msra.mxu0 %v3376_v1  ;;  %2383 = vmatprep.subr.bf16.mxu1 %v3377_v56 }
 0x6d4   :  { %2424 = vmatprep.subr.bf16.mxu0 %v3379_v55 }
 0x6d6   :  { %2384 = vmatpush2.bf16.msra.mxu1 %v3381_v5 }
 0x6d7   :  { %2425 = vmatpush2.bf16.msra.mxu0 %v3382_v6  ;;  %2385 = vmatprep.subr.bf16.mxu1 %v3383_v59 }
 0x6d8   :  { %2426 = vmatprep.subr.bf16.mxu0 %v3385_v60 }
 0x6da   :  { %2386 = vmatpush2.bf16.msra.mxu1 %v3387_v9 }
 0x6db   :  { %2427 = vmatpush2.bf16.msra.mxu0 %v3388_v63  ;;  %2387 = vmatprep.subr.bf16.mxu1 %v3389_v2 }
 0x6dc   :  { %2428 = vmatprep.subr.bf16.mxu0 %v3391_v10 }
 0x6de   :  { %2388 = vmatpush2.bf16.msra.mxu1 %v3393_v58 }
 0x6df   :  { %2429 = vmatpush2.bf16.msra.mxu0 %v3394_v12  ;;  %2389 = vmatprep.subr.bf16.mxu1 %v3395_v40 }
 0x6e0   :  { %2430 = vmatprep.subr.bf16.mxu0 %v3397_v13 }
 0x6e2   :  { %2390 = vmatpush2.bf16.msra.mxu1 %v3399_v14 }
 0x6e3   :  { %2431 = vmatpush2.bf16.msra.mxu0 %v3400_v16  ;;  %2391 = vmatprep.subr.bf16.mxu1 %v3401_v17 }
 0x6e4   :  { %2432 = vmatprep.subr.bf16.mxu0 %v3403_v19 }
 0x6e6   :  { %2392 = vmatpush2.bf16.msra.mxu1 %v3405_v20 }
 0x6e7   :  { %2433 = vmatpush2.bf16.msra.mxu0 %v3406_v21 }
 0x6e9   :  { %2394 = vmatmul.mubr.bf16.vlgmr.msra.gmra.mxu1 %v1961_v22 }
 0x6ea   :  { %2435 = vmatmul.mubr.bf16.vlgmr.msra.gmra.mxu0 %v1963_v23 }
 0x7a9   :  { %v2395_v28 = vpop.f32.mrf.mxu1 }
 0x7aa   :  { %v2436_v29 = vpop.f32.mrf.mxu0  ;;  %v2396_v30 = vadd.f32 %v2395_v28, %v2034_v26 }
 0x7ab   :  { %v2397_v31 = vpop.f32.mrf.mxu1 }
 0x7ac   :  { %v2438_v32 = vpop.f32.mrf.mxu0  ;;  %v2437_v33 = vadd.f32 %v2436_v29, %v2396_v30  ;;  %v2398_v34 = vadd.f32 %v2397_v31, %v2038_v27 }
 0x7ad   :  { %v2399_v35 = vpop.f32.mrf.mxu1 }
 0x7ae   :  { %v2440_v37 = vpop.f32.mrf.mxu0  ;;  %v2443_v38 = vmax.f32 %v2437_v33, 0.0  ;;  %v2439_v39 = vadd.f32 %v2438_v32, %v2398_v34 }
 0x7af   :  { %v2400_v41 = vpop.f32.mrf.mxu1 }
 0x7b0   :  { %v2441_v42 = vpop.f32.mrf.mxu0  ;;  %v2444_v43 = vmax.f32 %v2439_v39, 0.0 }
 0x7b1   :  { %3622 = dma.done.wait [#allocation7 + $0x1], 2048 }
 0x7b2   :  { %3623 = vsyncadd [#allocation7 + $0x1], 4294965248  ;;  %v2450_v44 = vpack.c.bf16 %v2444_v43, %v2444_v43  ;;  %v3408_v36 = vld [vmem:[#allocation6 + $0x78] sm:$0xff]   ;;  %v3410_v46 = vld [vmem:[#allocation6 + $0x70] sm:$0xff]   ;;  %v2449_v3 = vpack.c.bf16 %v2443_v38, %v2443_v38  ;;  %vm3651_vm0 = vmmov 0   ;;  %s3652_s16 = smov [#allocation20]  }
 0x7b3   :  { %v3409_v45 = vld [vmem:[#allocation6 + $0x38] sm:$0xff]   ;;  %3075 = vmatprep.subr.bf16.mxu1 %v3408_v36  ;;  %v3411_v47 = vld [vmem:[#allocation6 + $0x30] sm:$0xff]   ;;  %v3412_v48 = vld [vmem:[#allocation6 + $0x68] sm:$0xff]   ;;  %s2747_s17 = sshll.u32 %s3652_s16, 4  ;;  %vm2739_vm1 = vcmask 74752   ;;  %s2748_s17 = int_to_ptr.vmem [resolvable:$true] %s2747_s17 }
 0x7b4   :  { %2618 = vmatprep.mubr.bf16.mxu1 %v2450_v44  ;;  %3076 = vmatpush3.bf16.msra.mxu1 %v3409_v45  ;;  %v3413_v50 = vld [vmem:[#allocation6 + $0x28] sm:$0xff]   ;;  %v3414_v51 = vld [vmem:[#allocation6 + $0x60] sm:$0xff]   ;;  %v3416_v49 = vld [vmem:[#allocation6 + $0x58] sm:$0xff]   ;;  %p3597_p13 = scmp.lt.s32.totalorder %s2748_s17, %s2748_s17 }
 0x7b5   :  { %3077 = vmatprep.subr.bf16.mxu1 %v3410_v46  ;;  %v3415_v52 = vld [vmem:[#allocation6 + $0x20] sm:$0xff]   ;;  %v3417_v54 = vld [vmem:[#allocation6 + $0x18] sm:$0xff]   ;;  %v3418_v62 = vld [vmem:[#allocation6 + $0x50] sm:$0xff]  }
 0x7b6   :  { %v3419_v0 = vld [vmem:[#allocation6 + $0x10] sm:$0xff]   ;;  %v3420_v1 = vld [vmem:[#allocation6 + $0x48] sm:$0xff]   ;;  %v3422_v55 = vld [vmem:[#allocation6 + $0x40] sm:$0xff]  }
 0x7b7   :  { %v3421_v56 = vld [vmem:[#allocation6 + $0x8] sm:$0xff]   ;;  %v3423_v57 = vld [vmem:[#allocation6] sm:$0xff]   ;;  %v3425_v5 = vld [vmem:[#allocation19 + $0x30] sm:$0xff]  }
 0x7b8   :  { %3078 = vmatpush3.bf16.msra.mxu1 %v3411_v47  ;;  %v3424_v4 = vld [vmem:[#allocation19 + $0x38] sm:$0xff]   ;;  %v3426_v6 = vld [vmem:[#allocation19 + $0x28] sm:$0xff]   ;;  %v3427_v59 = vld [vmem:[#allocation19 + $0x20] sm:$0xff]  }
 0x7b9   :  { %3079 = vmatprep.subr.bf16.mxu1 %v3412_v48  ;;  %v3428_v60 = vld [vmem:[#allocation19 + $0x18] sm:$0xff]   ;;  %v3429_v61 = vld [vmem:[#allocation19 + $0x10] sm:$0xff]   ;;  %v3430_v7 = vld [vmem:[#allocation19 + $0x8] sm:$0xff]  }
 0x7ba   :  { %v3431_v8 = vld [vmem:[#allocation19] sm:$0xff]   ;;  %v2922_v9 = vld [vmem:[%s4178_s10] ss:$0 sm:$0xff]  ;;  %s3592_s10 = scalar_lea.vmem %s2748_s17, 32 }
 0x7bb   :  { %v2939_v13 = vld [vmem:[%s4180_s12] ss:$0 sm:$0xff]  ;;  %p3593_p12 = scmp.ne.s32.totalorder %s2748_s17, %s3592_s10  ;;  %p3598_p0 = scmp.lt.s32.totalorder %s3592_s10, %s3592_s10 }
 0x7bc   :  { %3080 = vmatpush3.bf16.msra.mxu1 %v3413_v50 }
 0x7bd   :  { %3081 = vmatprep.subr.bf16.mxu1 %v3414_v51  ;;  %p3599_p1 = por %p3598_p0, %p3597_p13 }
 0x7bf   :  { %p3600_p2 = pnand %p3599_p1, %p3593_p12 }
 0x7c0   :  { %3082 = vmatpush3.bf16.msra.mxu1 %v3415_v52 }
 0x7c1   :  { %3083 = vmatprep.subr.bf16.mxu1 %v3416_v49 }
 0x7c4   :  { %3084 = vmatpush3.bf16.msra.mxu1 %v3417_v54 }
 0x7c5   :  { %3085 = vmatprep.subr.bf16.mxu1 %v3418_v62 }
 0x7c8   :  { %3086 = vmatpush3.bf16.msra.mxu1 %v3419_v0 }
 0x7c9   :  { %3087 = vmatprep.subr.bf16.mxu1 %v3420_v1 }
 0x7cc   :  { %3088 = vmatpush3.bf16.msra.mxu1 %v3421_v56 }
 0x7cd   :  { %3089 = vmatprep.subr.bf16.mxu1 %v3422_v55 }
 0x7d0   :  { %3090 = vmatpush3.bf16.msra.mxu1 %v3423_v57 }
 0x7d1   :  { %3218 = vmatprep.subr.bf16.mxu1 %v3640_v18 }
 0x7d3   :  { %2619 = vmatmul.mubr.bf16.vlgmr.msra.gmra.mxu1 %v2449_v3 }
 0x7d4   :  { %3219 = vmatpush3.bf16.msra.mxu1 %v3424_v4  ;;  %3234 = vmatprep.mubr.msk.bf16.mxu1 %vm3651_vm0, %v3640_v18 }
 0x7d5   :  { %3220 = vmatprep.subr.bf16.mxu1 %v3640_v18 }
 0x7d8   :  { %3221 = vmatpush3.bf16.msra.mxu1 %v3425_v5 }
 0x7d9   :  { %3222 = vmatprep.subr.bf16.mxu1 %v3640_v18 }
 0x7dc   :  { %3223 = vmatpush3.bf16.msra.mxu1 %v3426_v6 }
 0x7dd   :  { %3224 = vmatprep.subr.bf16.mxu1 %v3640_v18 }
 0x7e0   :  { %3225 = vmatpush3.bf16.msra.mxu1 %v3427_v59 }
 0x7e1   :  { %3226 = vmatprep.subr.bf16.mxu1 %v3640_v18 }
 0x7e4   :  { %3227 = vmatpush3.bf16.msra.mxu1 %v3428_v60 }
 0x7e5   :  { %3228 = vmatprep.subr.bf16.mxu1 %v3640_v18 }
 0x7e8   :  { %3229 = vmatpush3.bf16.msra.mxu1 %v3429_v61 }
 0x7e9   :  { %3230 = vmatprep.subr.bf16.mxu1 %v3640_v18 }
 0x7ec   :  { %3231 = vmatpush3.bf16.msra.mxu1 %v3430_v7 }
 0x7ed   :  { %3232 = vmatprep.subr.bf16.mxu1 %v3640_v18 }
 0x7f0   :  { %3233 = vmatpush3.bf16.msra.mxu1 %v3431_v8 }
 0x893   :  { %v3091_v53 = vpop.f32.mrf.mxu1 }
 0x895   :  { %v3092_v63 = vpop.f32.mrf.mxu1 }
 0x896   :  { %v3093_v2 = vadd.f32 %v3092_v63, %v3091_v53 }
 0x897   :  { %v3094_v10 = vpop.f32.mrf.mxu1 }
 0x898   :  { %v2621_v11 = vadd.f32 %v3093_v2, %v2922_v9 }
 0x899   :  { %v3095_v58 = vpop.f32.mrf.mxu1 }
 0x89a   :  { %v2626_v12 = vmax.f32 %v2621_v11, 0.0 }
 0x89c   :  { %v2627_v40 = vpack.c.bf16 %v2626_v12, %v2626_v12 }
 0x89e   :  { %3235 = vmatmul.mubr.bf16.vlgmr.msra.gmra.mxu1 %v2627_v40 }
 0x95e   :  { %v2733_v18 = vpop.f32.mrf.mxu1 }
 0x95f   :  { %v2734_v14 = vadd.f32 %v2939_v13, %v2733_v18 }
 0x960   :  { %v3236_v16 = vpop.f32.mrf.mxu1 }
 0x961   :  { %2740 = vst.msk [vmem:[#allocation20] sm:$0x3] %vm2739_vm1, %v2734_v14 }
 0x962   :  { %v2736_v17 = vpop.f32.mrf.mxu1 }
 0x963   :  { %3603 = shalt.err (!%p3600_p2)
}
 0x964   :  { %2750 = dma.vmem_to_hbm [thread:$0]  %s2748_s17, 32, %s4181_s13, [#allocation10]   ;;  %v3237_v19 = vpop.f32.mrf.mxu1 }
 0x965   :  { %3624 = dma.done.wait [#allocation10], 32  }
 0x966   :  { %3625 = vsyncadd [#allocation10], 4294967264 }
 0x967   :  { %2754 = vsyncpa [#allocation9], 1 }
 0x968   :  { %2755 = vsyncpa [#allocation12], 1 }
 0x969   :  { %2756 = vsyncpa [#allocation15], 1 }
 0x96a   :  { %2757 = vsyncpa [#allocation18], 1 }
 0x96b   :  { %2758 = vsyncpa [#allocation10], 1 }
 0x96c   :  { %2759 = vsyncmov [#allocation7] }
 0x96f   :  { %s2760_s12 = vpop.sfrf %2759 }
 0x970   :  { %p2948_p3 = scmp.ne.s32.totalorder %s2760_s12, 0 }
 0x972   :  { %2764 = shalt.err (%p2948_p3)  }
 0x973   :  { %2766 = vsyncmov [#allocation7 + $0x1] }
 0x976   :  { %s2767_s6 = vpop.sfrf %2766 }
 0x977   :  { %p2949_p4 = scmp.ne.s32.totalorder %s2767_s6, 0 }
 0x979   :  { %2771 = shalt.err (%p2949_p4)  }

</bundles_post_ra>
